<compile_context>
chip_gen: v7x
topology: tpu7x:2x2x1
jax: 0.10.0
libtpu: 0.0.40
codegen_flags: <defaults>
</compile_context>

<pallas_src>
import functools
import math

import jax
import jax.numpy as jnp
from jax.experimental import pallas as pl
from jax.experimental.pallas import tpu as pltpu

_VMEM_LIMIT_BYTES = 48 * 1024 * 1024  # below v7x 64 MiB physical, above default scoped


def _pick_tile(n: int, target: int) -> int:
    """Largest tile <= target that divides n (multiple of 8 when tiling), else n."""
    if n <= target:
        return n
    for t in range(min(target, n), 7, -1):
        if n % t == 0 and t % 8 == 0:
            return t
    return n


def _const_spec(shape):
    """BlockSpec for a grid-invariant operand (weights/biases/LN params): same
    block at every grid point; single-buffered so it is resident once in VMEM
    instead of double-buffered (important on v7x's 64 MiB VMEM)."""
    ndim = len(shape)
    index_map = lambda *args: (0,) * ndim
    try:
        return pl.BlockSpec(shape, index_map, pipeline_mode=pl.Buffered(1))
    except Exception:  # pipeline_mode/Buffered unsupported -> default buffering
        return pl.BlockSpec(shape, index_map)


def _erf(x):
    # Abramowitz & Stegun 7.1.26 (max abs err ~1.5e-7). VPU + EUP ops only.
    a1, a2, a3, a4, a5 = (0.254829592, -0.284496736, 1.421413741,
                          -1.453152027, 1.061405429)
    p = 0.3275911
    sgn = jnp.where(x >= 0.0, 1.0, -1.0)
    ax = x * sgn
    t = pl.reciprocal(1.0 + p * ax, approx=True)   # EUP slot
    poly = ((((a5 * t + a4) * t + a3) * t + a2) * t + a1) * t
    return sgn * (1.0 - poly * jnp.exp(-ax * ax))


def _layer_norm(x, gamma, beta, eps):
    mu = jnp.mean(x, axis=-1, keepdims=True)
    xc = x - mu
    var = jnp.mean(xc * xc, axis=-1, keepdims=True)
    return xc * jax.lax.rsqrt(var + eps) * gamma + beta


# ---------------------------------------------------------------------------
# Kernel 1: fused QKV projection over row tiles of the flattened activations.
# Q is pre-scaled by 1/sqrt(d_head) (folded into wq/bq in the wrapper).
# ---------------------------------------------------------------------------
def _qkv_proj_kernel(x_ref, wqkv_ref, bqkv_ref, q_ref, k_ref, v_ref, *, d_model):
    xb = x_ref[...].astype(jnp.bfloat16)               # bf16 MXU operand
    qkv = jnp.dot(xb, wqkv_ref[...],
                  preferred_element_type=jnp.float32) + bqkv_ref[...]
    q_ref[...] = qkv[:, :d_model].astype(q_ref.dtype)
    k_ref[...] = qkv[:, d_model:2 * d_model].astype(k_ref.dtype)
    v_ref[...] = qkv[:, 2 * d_model:].astype(v_ref.dtype)


# ---------------------------------------------------------------------------
# Kernel 2: attention + out-proj + residual/LN1 + FFN + residual/LN2
#           per (batch, q-tile) grid point.
# ---------------------------------------------------------------------------
def _attn_ffn_kernel(q_ref, k_ref, v_ref, x_ref, wo_ref, bo_ref,
                     g1_ref, be1_ref, w1_ref, fb1_ref, w2_ref, fb2_ref,
                     g2_ref, be2_ref, out_ref, *, num_heads, d_head, ln_eps):
    bf16 = jnp.bfloat16
    q2 = q_ref[0]      # (TQ, D) bf16, already scaled by 1/sqrt(d_head)
    k2 = k_ref[0]      # (S,  D) bf16
    v2 = v_ref[0]      # (S,  D) bf16
    tq, d_model = q2.shape

    # Per-head attention; the head "concat" is folded into the output projection
    # by accumulating o_h @ wo[h*Dh:(h+1)*Dh, :] per head (no scratch, no masked
    # per-head stores, only one (TQ, S) score tile live at a time).
    # TODO(synk): flash-style online softmax over KV tiles for very large S.
    attn = jnp.zeros((tq, d_model), jnp.float32)
    for h in range(num_heads):
        sl = slice(h * d_head, (h + 1) * d_head)
        s = jnp.einsum("qd,kd->qk", q2[:, sl], k2[:, sl],
                       preferred_element_type=jnp.float32)          # (TQ, S)
        # TODO(synk): optional attention mask (masked_fill) not wired in (mask=None path).
        s = s - jnp.max(s, axis=-1, keepdims=True)
        p = jnp.exp(s)
        denom = jnp.sum(p, axis=-1, keepdims=True)                   # (TQ, 1)
        o_h = jnp.dot(p.astype(bf16), v2[:, sl],
                      preferred_element_type=jnp.float32)            # (TQ, Dh)
        o_h = o_h * pl.reciprocal(denom, approx=True)                # EUP slot
        attn = attn + jnp.dot(o_h.astype(bf16), wo_ref[sl, :],
                              preferred_element_type=jnp.float32)    # (TQ, D)
    attn = attn + bo_ref[...]

    # Residual + LayerNorm1 (dropout = identity at inference).
    h1 = _layer_norm(x_ref[0] + attn, g1_ref[...], be1_ref[...], ln_eps)

    # FFN: Linear -> GELU (exact erf via polynomial) -> Linear.
    f = jnp.dot(h1.astype(bf16), w1_ref[...],
                preferred_element_type=jnp.float32) + fb1_ref[...]
    f = 0.5 * f * (1.0 + _erf(f * 0.7071067811865476))
    f = jnp.dot(f.astype(bf16), w2_ref[...],
                preferred_element_type=jnp.float32) + fb2_ref[...]

    # Residual + LayerNorm2.
    out = _layer_norm(h1 + f, g2_ref[...], be2_ref[...], ln_eps)
    out_ref[0] = out.astype(out_ref.dtype)


def encoder_layer_forward(x, params, *, num_heads: int, ln_eps: float = 1e-5,
                          q_tile_target: int = 256, row_tile_target: int = 512):
    """Eval-mode forward of the PyTorch EncoderLayer. x: (B, S, D) float32.

    q_tile_target / row_tile_target: per-generation tuning knobs (review:
    ~512/1024 on v6e with its 128 MiB VMEM; ~128/256 on v7x / v5e).
    """
    B, S, D = x.shape
    assert D % num_heads == 0
    d_head = D // num_heads
    F = params["w1"].shape[0]
    f32, bf16 = jnp.float32, jnp.bfloat16

    def T(n):   # PyTorch Linear stores (out, in); transpose so kernels do x @ W + b
        return jnp.asarray(params[n], f32).T

    def R(n, w):
        return jnp.asarray(params[n], f32).reshape(1, w)

    scale = 1.0 / math.sqrt(float(d_head))
    # Fold the attention scale into the Q projection (free), weights in bf16.
    wqkv = jnp.concatenate([T("wq") * scale, T("wk"), T("wv")], axis=1).astype(bf16)
    bqkv = jnp.concatenate([R("bq", D) * scale, R("bk", D), R("bv", D)], axis=1)  # f32
    wo, bo = T("wo").astype(bf16), R("bo", D)
    w1, b1 = T("w1").astype(bf16), R("b1", F)          # (D, F), (1, F)
    w2, b2 = T("w2").astype(bf16), R("b2", D)          # (F, D), (1, D)
    g1, be1 = R("ln1_g", D), R("ln1_b", D)
    g2, be2 = R("ln2_g", D), R("ln2_b", D)

    # ---- Kernel 1: fused QKV projection -------------------------------------
    BS = B * S
    TR = _pick_tile(BS, row_tile_target)
    x2d = x.reshape(BS, D).astype(f32)
    q2d, k2d, v2d = pl.pallas_call(
        functools.partial(_qkv_proj_kernel, d_model=D),
        out_shape=(jax.ShapeDtypeStruct((BS, D), bf16),
                   jax.ShapeDtypeStruct((BS, D), bf16),
                   jax.ShapeDtypeStruct((BS, D), bf16)),
        grid_spec=pltpu.PrefetchScalarGridSpec(
            num_scalar_prefetch=0,
            grid=(BS // TR,),
            in_specs=[
                pl.BlockSpec((TR, D), lambda i: (i, 0)),
                _const_spec((D, 3 * D)),      # wqkv (bf16), single-buffered
                _const_spec((1, 3 * D)),      # bqkv (f32)
            ],
            out_specs=(
                pl.BlockSpec((TR, D), lambda i: (i, 0)),
                pl.BlockSpec((TR, D), lambda i: (i, 0)),
                pl.BlockSpec((TR, D), lambda i: (i, 0)),
            ),
        ),
        compiler_params=pltpu.CompilerParams(
            dimension_semantics=("parallel",),
            vmem_limit_bytes=_VMEM_LIMIT_BYTES),
        cost_estimate=pl.CostEstimate(
            flops=2 * BS * D * 3 * D,
            transcendentals=0,
            bytes_accessed=4 * BS * D + 2 * 3 * D * D + 4 * 3 * D + 2 * BS * 3 * D),
    )(x2d, wqkv, bqkv)

    # Free reshape (BS, D) -> (B, S, D); no head-split transpose round trip
    # through HBM -- kernel 2 does the per-head relayout in-kernel.
    q3 = q2d.reshape(B, S, D)
    k3 = k2d.reshape(B, S, D)
    v3 = v2d.reshape(B, S, D)

    # ---- Kernel 2: attention + residual/LN + FFN + residual/LN ---------------
    TQ = _pick_tile(S, q_tile_target)
    QT = S // TQ
    flops = 4 * B * S * S * D + 2 * B * S * D * D + 4 * B * S * D * F
    trans = B * num_heads * S * S + B * S * F
    bytes_accessed = (2 * 3 * B * S * D          # bf16 q/k/v
                      + 4 * B * S * D            # f32 residual x
                      + 4 * B * S * D            # f32 output
                      + 2 * (D * D + 2 * D * F)  # bf16 weights
                      + 4 * (6 * D + F))         # f32 biases / LN params

    out = pl.pallas_call(
        functools.partial(_attn_ffn_kernel, num_heads=num_heads,
                          d_head=d_head, ln_eps=ln_eps),
        out_shape=jax.ShapeDtypeStruct((B, S, D), x.dtype),
        grid_spec=pltpu.PrefetchScalarGridSpec(
            num_scalar_prefetch=0,
            grid=(B, QT),
            in_specs=[
                pl.BlockSpec((1, TQ, D), lambda b, qi: (b, qi, 0)),  # q tile
                pl.BlockSpec((1, S, D), lambda b, qi: (b, 0, 0)),    # k (full S)
                pl.BlockSpec((1, S, D), lambda b, qi: (b, 0, 0)),    # v (full S)
                pl.BlockSpec((1, TQ, D), lambda b, qi: (b, qi, 0)),  # x residual
                _const_spec((D, D)),     # wo (bf16)
                _const_spec((1, D)),     # bo
                _const_spec((1, D)),     # ln1 gamma
                _const_spec((1, D)),     # ln1 beta
                _const_spec((D, F)),     # ffn w1 (bf16)
                _const_spec((1, F)),     # ffn b1
                _const_spec((F, D)),     # ffn w2 (bf16)
                _const_spec((1, D)),     # ffn b2
                _const_spec((1, D)),     # ln2 gamma
                _const_spec((1, D)),     # ln2 beta
            ],
            out_specs=pl.BlockSpec((1, TQ, D), lambda b, qi: (b, qi, 0)),
        ),
        compiler_params=pltpu.CompilerParams(
            dimension_semantics=("parallel", "parallel"),
            vmem_limit_bytes=_VMEM_LIMIT_BYTES),
        cost_estimate=pl.CostEstimate(flops=flops, transcendentals=trans,
                                      bytes_accessed=bytes_accessed),
    )(q3, k3, v3, x.astype(f32), wo, bo, g1, be1, w1, b1, w2, b2, g2, be2)
    return out


def _reference(x, params, num_heads, ln_eps=1e-5):
    """Pure-JAX f32 reference mirroring the PyTorch EncoderLayer (eval mode)."""
    B, S, D = x.shape
    dh = D // num_heads

    def lin(t, w, b):
        return t @ jnp.asarray(w).T + jnp.asarray(b)

    q = lin(x, params["wq"], params["bq"])
    k = lin(x, params["wk"], params["bk"])
    v = lin(x, params["wv"], params["bv"])

    def split(t):
        return t.reshape(B, S, num_heads, dh).transpose(0, 2, 1, 3)

    q, k, v = split(q), split(k), split(v)
    score = jnp.einsum("bhqd,bhkd->bhqk", q, k) / (dh ** 0.5)
    prob = jax.nn.softmax(score, axis=-1)
    o = jnp.einsum("bhqk,bhkd->bhqd", prob, v)
    o = o.transpose(0, 2, 1, 3).reshape(B, S, D)
    attn = lin(o, params["wo"], params["bo"])

    def layer_norm(t, g, b):
        mu = jnp.mean(t, axis=-1, keepdims=True)
        var = jnp.mean((t - mu) ** 2, axis=-1, keepdims=True)
        return (t - mu) / jnp.sqrt(var + ln_eps) * jnp.asarray(g) + jnp.asarray(b)

    h1 = layer_norm(x + attn, params["ln1_g"], params["ln1_b"])
    f = lin(h1, params["w1"], params["b1"])
    f = jax.nn.gelu(f, approximate=False)            # PyTorch nn.GELU() default (erf)
    f = lin(f, params["w2"], params["b2"])
    return layer_norm(h1 + f, params["ln2_g"], params["ln2_b"])


if __name__ == "__main__":
    # Small shapes consistent with the module: d_model divisible by num_heads.
    B, S, D, H, F = 2, 8, 32, 4, 64

    key = jax.random.PRNGKey(0)
    ks = jax.random.split(key, 16)
    sc_d = 1.0 / (D ** 0.5)
    sc_f = 1.0 / (F ** 0.5)
    u = lambda k, shape, s: jax.random.uniform(k, shape, jnp.float32, -s, s)

    params = {
        "wq": u(ks[0], (D, D), sc_d), "bq": u(ks[1], (D,), sc_d),
        "wk": u(ks[2], (D, D), sc_d), "bk": u(ks[3], (D,), sc_d),
        "wv": u(ks[4], (D, D), sc_d), "bv": u(ks[5], (D,), sc_d),
        "wo": u(ks[6], (D, D), sc_d), "bo": u(ks[7], (D,), sc_d),
        "w1": u(ks[8], (F, D), sc_d), "b1": u(ks[9], (F,), sc_d),
        "w2": u(ks[10], (D, F), sc_f), "b2": u(ks[11], (D,), sc_f),
        "ln1_g": 1.0 + 0.1 * jax.random.normal(ks[12], (D,), jnp.float32),
        "ln1_b": 0.1 * jax.random.normal(ks[13], (D,), jnp.float32),
        "ln2_g": 1.0 + 0.1 * jax.random.normal(ks[14], (D,), jnp.float32),
        "ln2_b": 0.1 * jax.random.normal(ks[15], (D,), jnp.float32),
    }
    x = jax.random.normal(jax.random.PRNGKey(1), (B, S, D), jnp.float32)

    fwd = jax.jit(functools.partial(encoder_layer_forward, num_heads=H))
    out = jax.block_until_ready(fwd(x, params))

    ref = _reference(x, params, H)
    assert out.shape == (B, S, D)
    max_err = float(jnp.max(jnp.abs(out - ref)))
    # Tolerance accounts for bf16 MXU operands (f32 accumulation) and the
    # approx-reciprocal softmax/GELU paths; reference is exact f32.
    assert jnp.allclose(out, ref, atol=3e-2, rtol=3e-2), \
        f"mismatch vs reference (max|diff|={max_err})"

    print("KERNEL_OK")
</pallas_src>

<mosaic_0001>
module attributes {stable_mosaic.version = 11 : i64} {
  func.func @_qkv_proj_kernel(%arg0: i32, %arg1: memref<16x32xf32, #tpu.memory_space<vmem>>, %arg2: memref<32x96xbf16, #tpu.memory_space<vmem>>, %arg3: memref<1x96xf32, #tpu.memory_space<vmem>>, %arg4: memref<16x32xbf16, #tpu.memory_space<vmem>>, %arg5: memref<16x32xbf16, #tpu.memory_space<vmem>>, %arg6: memref<16x32xbf16, #tpu.memory_space<vmem>>) attributes {dimension_semantics = [#tpu.dimension_semantics<parallel>], iteration_bounds = array<i64: 1>, scalar_prefetch = 0 : i64, scratch_operands = 0 : i64, tpu.core_type = #tpu.core_type<tc>, window_params = [{transform_indices = @transform_0, window_bounds = array<i64: 16, 32>}, {pipeline_mode = #tpu.pipeline_mode<synchronous>, transform_indices = @transform_1, window_bounds = array<i64: 32, 96>}, {pipeline_mode = #tpu.pipeline_mode<synchronous>, transform_indices = @transform_2, window_bounds = array<i64: 1, 96>}, {transform_indices = @transform_3, window_bounds = array<i64: 16, 32>}, {transform_indices = @transform_4, window_bounds = array<i64: 16, 32>}, {transform_indices = @transform_5, window_bounds = array<i64: 16, 32>}]} {
    %c0 = arith.constant 0 : index
    %c0_0 = arith.constant 0 : index
    %0 = vector.load %arg1[%c0, %c0_0] : memref<16x32xf32, #tpu.memory_space<vmem>>, vector<16x32xf32>
    %1 = arith.truncf %0 : vector<16x32xf32> to vector<16x32xbf16>
    %c0_1 = arith.constant 0 : index
    %c0_2 = arith.constant 0 : index
    %2 = vector.load %arg2[%c0_1, %c0_2] : memref<32x96xbf16, #tpu.memory_space<vmem>>, vector<32x96xbf16>
    %cst = arith.constant dense<0.000000e+00> : vector<16x96xf32>
    %3 = tpu.matmul %1, %2, %cst {dimension_numbers = #tpu.dot_dimension_numbers<[1], [0], [0], [1], [0, 0, 1, 1], [], []>} : vector<16x32xbf16>, vector<32x96xbf16>, vector<16x96xf32> -> vector<16x96xf32>
    %c0_3 = arith.constant 0 : index
    %c0_4 = arith.constant 0 : index
    %4 = vector.load %arg3[%c0_3, %c0_4] : memref<1x96xf32, #tpu.memory_space<vmem>>, vector<1x96xf32>
    %5 = vector.broadcast %4 : vector<1x96xf32> to vector<16x96xf32>
    %6 = arith.addf %3, %5 : vector<16x96xf32>
    %7 = vector.extract_strided_slice %6 {offsets = [0, 0], sizes = [16, 32], strides = [1, 1]} : vector<16x96xf32> to vector<16x32xf32>
    %8 = arith.truncf %7 : vector<16x32xf32> to vector<16x32xbf16>
    %c0_5 = arith.constant 0 : index
    %c0_6 = arith.constant 0 : index
    %9 = vector.load %arg4[%c0_5, %c0_6] : memref<16x32xbf16, #tpu.memory_space<vmem>>, vector<16x32xbf16>
    tpu.vector_store %arg4[%c0_5, %c0_6], %8 {strides = array<i32>} : memref<16x32xbf16, #tpu.memory_space<vmem>>, vector<16x32xbf16>,
    %10 = vector.extract_strided_slice %6 {offsets = [0, 32], sizes = [16, 32], strides = [1, 1]} : vector<16x96xf32> to vector<16x32xf32>
    %11 = arith.truncf %10 : vector<16x32xf32> to vector<16x32xbf16>
    %c0_7 = arith.constant 0 : index
    %c0_8 = arith.constant 0 : index
    %12 = vector.load %arg5[%c0_7, %c0_8] : memref<16x32xbf16, #tpu.memory_space<vmem>>, vector<16x32xbf16>
    tpu.vector_store %arg5[%c0_7, %c0_8], %11 {strides = array<i32>} : memref<16x32xbf16, #tpu.memory_space<vmem>>, vector<16x32xbf16>,
    %13 = vector.extract_strided_slice %6 {offsets = [0, 64], sizes = [16, 32], strides = [1, 1]} : vector<16x96xf32> to vector<16x32xf32>
    %14 = arith.truncf %13 : vector<16x32xf32> to vector<16x32xbf16>
    %c0_9 = arith.constant 0 : index
    %c0_10 = arith.constant 0 : index
    %15 = vector.load %arg6[%c0_9, %c0_10] : memref<16x32xbf16, #tpu.memory_space<vmem>>, vector<16x32xbf16>
    tpu.vector_store %arg6[%c0_9, %c0_10], %14 {strides = array<i32>} : memref<16x32xbf16, #tpu.memory_space<vmem>>, vector<16x32xbf16>,
    return
  }
  func.func @transform_0(%arg0: i32) -> (i32, i32) {
    %c0_i32 = arith.constant 0 : i32
    %c0_i32_0 = arith.constant 0 : i32
    return %arg0, %c0_i32 : i32, i32
  }
  func.func @transform_1(%arg0: i32) -> (i32, i32) {
    %c0_i32 = arith.constant 0 : i32
    %c0_i32_0 = arith.constant 0 : i32
    %c0_i32_1 = arith.constant 0 : i32
    return %c0_i32, %c0_i32_0 : i32, i32
  }
  func.func @transform_2(%arg0: i32) -> (i32, i32) {
    %c0_i32 = arith.constant 0 : i32
    %c0_i32_0 = arith.constant 0 : i32
    %c0_i32_1 = arith.constant 0 : i32
    return %c0_i32, %c0_i32_0 : i32, i32
  }
  func.func @transform_3(%arg0: i32) -> (i32, i32) {
    %c0_i32 = arith.constant 0 : i32
    %c0_i32_0 = arith.constant 0 : i32
    return %arg0, %c0_i32 : i32, i32
  }
  func.func @transform_4(%arg0: i32) -> (i32, i32) {
    %c0_i32 = arith.constant 0 : i32
    %c0_i32_0 = arith.constant 0 : i32
    return %arg0, %c0_i32 : i32, i32
  }
  func.func @transform_5(%arg0: i32) -> (i32, i32) {
    %c0_i32 = arith.constant 0 : i32
    %c0_i32_0 = arith.constant 0 : i32
    return %arg0, %c0_i32 : i32, i32
  }
}

module attributes {stable_mosaic.version = 11 : i64} {
  func.func @_attn_ffn_kernel(%arg0: i32, %arg1: i32, %arg2: memref<1x8x32xbf16, #tpu.memory_space<vmem>>, %arg3: memref<1x8x32xbf16, #tpu.memory_space<vmem>>, %arg4: memref<1x8x32xbf16, #tpu.memory_space<vmem>>, %arg5: memref<1x8x32xf32, #tpu.memory_space<vmem>>, %arg6: memref<32x32xbf16, #tpu.memory_space<vmem>>, %arg7: memref<1x32xf32, #tpu.memory_space<vmem>>, %arg8: memref<1x32xf32, #tpu.memory_space<vmem>>, %arg9: memref<1x32xf32, #tpu.memory_space<vmem>>, %arg10: memref<32x64xbf16, #tpu.memory_space<vmem>>, %arg11: memref<1x64xf32, #tpu.memory_space<vmem>>, %arg12: memref<64x32xbf16, #tpu.memory_space<vmem>>, %arg13: memref<1x32xf32, #tpu.memory_space<vmem>>, %arg14: memref<1x32xf32, #tpu.memory_space<vmem>>, %arg15: memref<1x32xf32, #tpu.memory_space<vmem>>, %arg16: memref<1x8x32xf32, #tpu.memory_space<vmem>>) attributes {dimension_semantics = [#tpu.dimension_semantics<parallel>, #tpu.dimension_semantics<parallel>], iteration_bounds = array<i64: 2, 1>, scalar_prefetch = 0 : i64, scratch_operands = 0 : i64, tpu.core_type = #tpu.core_type<tc>, window_params = [{transform_indices = @transform_0, window_bounds = array<i64: 1, 8, 32>}, {transform_indices = @transform_1, window_bounds = array<i64: 1, 8, 32>}, {transform_indices = @transform_2, window_bounds = array<i64: 1, 8, 32>}, {transform_indices = @transform_3, window_bounds = array<i64: 1, 8, 32>}, {pipeline_mode = #tpu.pipeline_mode<synchronous>, transform_indices = @transform_4, window_bounds = array<i64: 32, 32>}, {pipeline_mode = #tpu.pipeline_mode<synchronous>, transform_indices = @transform_5, window_bounds = array<i64: 1, 32>}, {pipeline_mode = #tpu.pipeline_mode<synchronous>, transform_indices = @transform_6, window_bounds = array<i64: 1, 32>}, {pipeline_mode = #tpu.pipeline_mode<synchronous>, transform_indices = @transform_7, window_bounds = array<i64: 1, 32>}, {pipeline_mode = #tpu.pipeline_mode<synchronous>, transform_indices = @transform_8, window_bounds = array<i64: 32, 64>}, {pipeline_mode = #tpu.pipeline_mode<synchronous>, transform_indices = @transform_9, window_bounds = array<i64: 1, 64>}, {pipeline_mode = #tpu.pipeline_mode<synchronous>, transform_indices = @transform_10, window_bounds = array<i64: 64, 32>}, {pipeline_mode = #tpu.pipeline_mode<synchronous>, transform_indices = @transform_11, window_bounds = array<i64: 1, 32>}, {pipeline_mode = #tpu.pipeline_mode<synchronous>, transform_indices = @transform_12, window_bounds = array<i64: 1, 32>}, {pipeline_mode = #tpu.pipeline_mode<synchronous>, transform_indices = @transform_13, window_bounds = array<i64: 1, 32>}, {transform_indices = @transform_14, window_bounds = array<i64: 1, 8, 32>}]} {
    %c0 = arith.constant 0 : index
    %c0_0 = arith.constant 0 : index
    %c0_1 = arith.constant 0 : index
    %0 = vector.load %arg2[%c0, %c0_0, %c0_1] : memref<1x8x32xbf16, #tpu.memory_space<vmem>>, vector<1x8x32xbf16>
    %1 = vector.shape_cast %0 : vector<1x8x32xbf16> to vector<8x32xbf16>
    %c0_2 = arith.constant 0 : index
    %c0_3 = arith.constant 0 : index
    %c0_4 = arith.constant 0 : index
    %2 = vector.load %arg3[%c0_2, %c0_3, %c0_4] : memref<1x8x32xbf16, #tpu.memory_space<vmem>>, vector<1x8x32xbf16>
    %3 = vector.shape_cast %2 : vector<1x8x32xbf16> to vector<8x32xbf16>
    %c0_5 = arith.constant 0 : index
    %c0_6 = arith.constant 0 : index
    %c0_7 = arith.constant 0 : index
    %4 = vector.load %arg4[%c0_5, %c0_6, %c0_7] : memref<1x8x32xbf16, #tpu.memory_space<vmem>>, vector<1x8x32xbf16>
    %5 = vector.shape_cast %4 : vector<1x8x32xbf16> to vector<8x32xbf16>
    %cst = arith.constant 0.000000e+00 : f32
    %6 = vector.broadcast %cst : f32 to vector<8x32xf32>
    %7 = vector.extract_strided_slice %1 {offsets = [0, 0], sizes = [8, 8], strides = [1, 1]} : vector<8x32xbf16> to vector<8x8xbf16>
    %8 = vector.extract_strided_slice %3 {offsets = [0, 0], sizes = [8, 8], strides = [1, 1]} : vector<8x32xbf16> to vector<8x8xbf16>
    "tpu.trace_start"() <{level = 10 : i32, message = "qd,kd->qk"}> : () -> ()
    %cst_8 = arith.constant dense<0.000000e+00> : vector<8x8xf32>
    %9 = tpu.matmul %7, %8, %cst_8 {dimension_numbers = #tpu.dot_dimension_numbers<[1], [1], [0], [0], [0, 0, 1, 0], [], []>} : vector<8x8xbf16>, vector<8x8xbf16>, vector<8x8xf32> -> vector<8x8xf32>
    "tpu.trace_stop"() : () -> ()
    %cst_9 = arith.constant dense<0xFF800000> : vector<8xf32>
    %10 = vector.multi_reduction <maximumf>, %9, %cst_9 [1] : vector<8x8xf32> to vector<8xf32>
    %11 = vector.shape_cast %10 : vector<8xf32> to vector<8x1xf32>
    %12 = vector.broadcast %11 : vector<8x1xf32> to vector<8x8xf32>
    %13 = arith.subf %9, %12 : vector<8x8xf32>
    %14 = math.exp %13 : vector<8x8xf32>
    %cst_10 = arith.constant dense<0.000000e+00> : vector<8xf32>
    %15 = vector.multi_reduction <add>, %14, %cst_10 [1] : vector<8x8xf32> to vector<8xf32>
    %16 = vector.shape_cast %15 : vector<8xf32> to vector<8x1xf32>
    %17 = arith.truncf %14 : vector<8x8xf32> to vector<8x8xbf16>
    %18 = vector.extract_strided_slice %5 {offsets = [0, 0], sizes = [8, 8], strides = [1, 1]} : vector<8x32xbf16> to vector<8x8xbf16>
    %cst_11 = arith.constant dense<0.000000e+00> : vector<8x8xf32>
    %19 = tpu.matmul %17, %18, %cst_11 {dimension_numbers = #tpu.dot_dimension_numbers<[1], [0], [0], [1], [0, 0, 1, 1], [], []>} : vector<8x8xbf16>, vector<8x8xbf16>, vector<8x8xf32> -> vector<8x8xf32>
    %20 = tpu.reciprocal %16 {approx = true} : vector<8x1xf32> -> vector<8x1xf32>
    %21 = vector.broadcast %20 : vector<8x1xf32> to vector<8x8xf32>
    %22 = arith.mulf %19, %21 : vector<8x8xf32>
    %23 = arith.truncf %22 : vector<8x8xf32> to vector<8x8xbf16>
    %c0_12 = arith.constant 0 : index
    %c0_13 = arith.constant 0 : index
    %24 = vector.load %arg6[%c0_12, %c0_13] : memref<32x32xbf16, #tpu.memory_space<vmem>>, vector<8x32xbf16>
    %cst_14 = arith.constant dense<0.000000e+00> : vector<8x32xf32>
    %25 = tpu.matmul %23, %24, %cst_14 {dimension_numbers = #tpu.dot_dimension_numbers<[1], [0], [0], [1], [0, 0, 1, 1], [], []>} : vector<8x8xbf16>, vector<8x32xbf16>, vector<8x32xf32> -> vector<8x32xf32>
    %26 = arith.addf %6, %25 : vector<8x32xf32>
    %27 = vector.extract_strided_slice %1 {offsets = [0, 8], sizes = [8, 8], strides = [1, 1]} : vector<8x32xbf16> to vector<8x8xbf16>
    %28 = vector.extract_strided_slice %3 {offsets = [0, 8], sizes = [8, 8], strides = [1, 1]} : vector<8x32xbf16> to vector<8x8xbf16>
    "tpu.trace_start"() <{level = 10 : i32, message = "qd,kd->qk"}> : () -> ()
    %cst_15 = arith.constant dense<0.000000e+00> : vector<8x8xf32>
    %29 = tpu.matmul %27, %28, %cst_15 {dimension_numbers = #tpu.dot_dimension_numbers<[1], [1], [0], [0], [0, 0, 1, 0], [], []>} : vector<8x8xbf16>, vector<8x8xbf16>, vector<8x8xf32> -> vector<8x8xf32>
    "tpu.trace_stop"() : () -> ()
    %cst_16 = arith.constant dense<0xFF800000> : vector<8xf32>
    %30 = vector.multi_reduction <maximumf>, %29, %cst_16 [1] : vector<8x8xf32> to vector<8xf32>
    %31 = vector.shape_cast %30 : vector<8xf32> to vector<8x1xf32>
    %32 = vector.broadcast %31 : vector<8x1xf32> to vector<8x8xf32>
    %33 = arith.subf %29, %32 : vector<8x8xf32>
    %34 = math.exp %33 : vector<8x8xf32>
    %cst_17 = arith.constant dense<0.000000e+00> : vector<8xf32>
    %35 = vector.multi_reduction <add>, %34, %cst_17 [1] : vector<8x8xf32> to vector<8xf32>
    %36 = vector.shape_cast %35 : vector<8xf32> to vector<8x1xf32>
    %37 = arith.truncf %34 : vector<8x8xf32> to vector<8x8xbf16>
    %38 = vector.extract_strided_slice %5 {offsets = [0, 8], sizes = [8, 8], strides = [1, 1]} : vector<8x32xbf16> to vector<8x8xbf16>
    %cst_18 = arith.constant dense<0.000000e+00> : vector<8x8xf32>
    %39 = tpu.matmul %37, %38, %cst_18 {dimension_numbers = #tpu.dot_dimension_numbers<[1], [0], [0], [1], [0, 0, 1, 1], [], []>} : vector<8x8xbf16>, vector<8x8xbf16>, vector<8x8xf32> -> vector<8x8xf32>
    %40 = tpu.reciprocal %36 {approx = true} : vector<8x1xf32> -> vector<8x1xf32>
    %41 = vector.broadcast %40 : vector<8x1xf32> to vector<8x8xf32>
    %42 = arith.mulf %39, %41 : vector<8x8xf32>
    %43 = arith.truncf %42 : vector<8x8xf32> to vector<8x8xbf16>
    %c8 = arith.constant 8 : index
    %c0_19 = arith.constant 0 : index
    %44 = vector.load %arg6[%c8, %c0_19] : memref<32x32xbf16, #tpu.memory_space<vmem>>, vector<8x32xbf16>
    %cst_20 = arith.constant dense<0.000000e+00> : vector<8x32xf32>
    %45 = tpu.matmul %43, %44, %cst_20 {dimension_numbers = #tpu.dot_dimension_numbers<[1], [0], [0], [1], [0, 0, 1, 1], [], []>} : vector<8x8xbf16>, vector<8x32xbf16>, vector<8x32xf32> -> vector<8x32xf32>
    %46 = arith.addf %26, %45 : vector<8x32xf32>
    %47 = vector.extract_strided_slice %1 {offsets = [0, 16], sizes = [8, 8], strides = [1, 1]} : vector<8x32xbf16> to vector<8x8xbf16>
    %48 = vector.extract_strided_slice %3 {offsets = [0, 16], sizes = [8, 8], strides = [1, 1]} : vector<8x32xbf16> to vector<8x8xbf16>
    "tpu.trace_start"() <{level = 10 : i32, message = "qd,kd->qk"}> : () -> ()
    %cst_21 = arith.constant dense<0.000000e+00> : vector<8x8xf32>
    %49 = tpu.matmul %47, %48, %cst_21 {dimension_numbers = #tpu.dot_dimension_numbers<[1], [1], [0], [0], [0, 0, 1, 0], [], []>} : vector<8x8xbf16>, vector<8x8xbf16>, vector<8x8xf32> -> vector<8x8xf32>
    "tpu.trace_stop"() : () -> ()
    %cst_22 = arith.constant dense<0xFF800000> : vector<8xf32>
    %50 = vector.multi_reduction <maximumf>, %49, %cst_22 [1] : vector<8x8xf32> to vector<8xf32>
    %51 = vector.shape_cast %50 : vector<8xf32> to vector<8x1xf32>
    %52 = vector.broadcast %51 : vector<8x1xf32> to vector<8x8xf32>
    %53 = arith.subf %49, %52 : vector<8x8xf32>
    %54 = math.exp %53 : vector<8x8xf32>
    %cst_23 = arith.constant dense<0.000000e+00> : vector<8xf32>
    %55 = vector.multi_reduction <add>, %54, %cst_23 [1] : vector<8x8xf32> to vector<8xf32>
    %56 = vector.shape_cast %55 : vector<8xf32> to vector<8x1xf32>
    %57 = arith.truncf %54 : vector<8x8xf32> to vector<8x8xbf16>
    %58 = vector.extract_strided_slice %5 {offsets = [0, 16], sizes = [8, 8], strides = [1, 1]} : vector<8x32xbf16> to vector<8x8xbf16>
    %cst_24 = arith.constant dense<0.000000e+00> : vector<8x8xf32>
    %59 = tpu.matmul %57, %58, %cst_24 {dimension_numbers = #tpu.dot_dimension_numbers<[1], [0], [0], [1], [0, 0, 1, 1], [], []>} : vector<8x8xbf16>, vector<8x8xbf16>, vector<8x8xf32> -> vector<8x8xf32>
    %60 = tpu.reciprocal %56 {approx = true} : vector<8x1xf32> -> vector<8x1xf32>
    %61 = vector.broadcast %60 : vector<8x1xf32> to vector<8x8xf32>
    %62 = arith.mulf %59, %61 : vector<8x8xf32>
    %63 = arith.truncf %62 : vector<8x8xf32> to vector<8x8xbf16>
    %c16 = arith.constant 16 : index
    %c0_25 = arith.constant 0 : index
    %64 = vector.load %arg6[%c16, %c0_25] : memref<32x32xbf16, #tpu.memory_space<vmem>>, vector<8x32xbf16>
    %cst_26 = arith.constant dense<0.000000e+00> : vector<8x32xf32>
    %65 = tpu.matmul %63, %64, %cst_26 {dimension_numbers = #tpu.dot_dimension_numbers<[1], [0], [0], [1], [0, 0, 1, 1], [], []>} : vector<8x8xbf16>, vector<8x32xbf16>, vector<8x32xf32> -> vector<8x32xf32>
    %66 = arith.addf %46, %65 : vector<8x32xf32>
    %67 = vector.extract_strided_slice %1 {offsets = [0, 24], sizes = [8, 8], strides = [1, 1]} : vector<8x32xbf16> to vector<8x8xbf16>
    %68 = vector.extract_strided_slice %3 {offsets = [0, 24], sizes = [8, 8], strides = [1, 1]} : vector<8x32xbf16> to vector<8x8xbf16>
    "tpu.trace_start"() <{level = 10 : i32, message = "qd,kd->qk"}> : () -> ()
    %cst_27 = arith.constant dense<0.000000e+00> : vector<8x8xf32>
    %69 = tpu.matmul %67, %68, %cst_27 {dimension_numbers = #tpu.dot_dimension_numbers<[1], [1], [0], [0], [0, 0, 1, 0], [], []>} : vector<8x8xbf16>, vector<8x8xbf16>, vector<8x8xf32> -> vector<8x8xf32>
    "tpu.trace_stop"() : () -> ()
    %cst_28 = arith.constant dense<0xFF800000> : vector<8xf32>
    %70 = vector.multi_reduction <maximumf>, %69, %cst_28 [1] : vector<8x8xf32> to vector<8xf32>
    %71 = vector.shape_cast %70 : vector<8xf32> to vector<8x1xf32>
    %72 = vector.broadcast %71 : vector<8x1xf32> to vector<8x8xf32>
    %73 = arith.subf %69, %72 : vector<8x8xf32>
    %74 = math.exp %73 : vector<8x8xf32>
    %cst_29 = arith.constant dense<0.000000e+00> : vector<8xf32>
    %75 = vector.multi_reduction <add>, %74, %cst_29 [1] : vector<8x8xf32> to vector<8xf32>
    %76 = vector.shape_cast %75 : vector<8xf32> to vector<8x1xf32>
    %77 = arith.truncf %74 : vector<8x8xf32> to vector<8x8xbf16>
    %78 = vector.extract_strided_slice %5 {offsets = [0, 24], sizes = [8, 8], strides = [1, 1]} : vector<8x32xbf16> to vector<8x8xbf16>
    %cst_30 = arith.constant dense<0.000000e+00> : vector<8x8xf32>
    %79 = tpu.matmul %77, %78, %cst_30 {dimension_numbers = #tpu.dot_dimension_numbers<[1], [0], [0], [1], [0, 0, 1, 1], [], []>} : vector<8x8xbf16>, vector<8x8xbf16>, vector<8x8xf32> -> vector<8x8xf32>
    %80 = tpu.reciprocal %76 {approx = true} : vector<8x1xf32> -> vector<8x1xf32>
    %81 = vector.broadcast %80 : vector<8x1xf32> to vector<8x8xf32>
    %82 = arith.mulf %79, %81 : vector<8x8xf32>
    %83 = arith.truncf %82 : vector<8x8xf32> to vector<8x8xbf16>
    %c24 = arith.constant 24 : index
    %c0_31 = arith.constant 0 : index
    %84 = vector.load %arg6[%c24, %c0_31] : memref<32x32xbf16, #tpu.memory_space<vmem>>, vector<8x32xbf16>
    %cst_32 = arith.constant dense<0.000000e+00> : vector<8x32xf32>
    %85 = tpu.matmul %83, %84, %cst_32 {dimension_numbers = #tpu.dot_dimension_numbers<[1], [0], [0], [1], [0, 0, 1, 1], [], []>} : vector<8x8xbf16>, vector<8x32xbf16>, vector<8x32xf32> -> vector<8x32xf32>
    %86 = arith.addf %66, %85 : vector<8x32xf32>
    %c0_33 = arith.constant 0 : index
    %c0_34 = arith.constant 0 : index
    %87 = vector.load %arg7[%c0_33, %c0_34] : memref<1x32xf32, #tpu.memory_space<vmem>>, vector<1x32xf32>
    %88 = vector.broadcast %87 : vector<1x32xf32> to vector<8x32xf32>
    %89 = arith.addf %86, %88 : vector<8x32xf32>
    %c0_35 = arith.constant 0 : index
    %c0_36 = arith.constant 0 : index
    %c0_37 = arith.constant 0 : index
    %90 = vector.load %arg5[%c0_35, %c0_36, %c0_37] : memref<1x8x32xf32, #tpu.memory_space<vmem>>, vector<1x8x32xf32>
    %91 = vector.shape_cast %90 : vector<1x8x32xf32> to vector<8x32xf32>
    %92 = arith.addf %91, %89 : vector<8x32xf32>
    %c0_38 = arith.constant 0 : index
    %c0_39 = arith.constant 0 : index
    %93 = vector.load %arg8[%c0_38, %c0_39] : memref<1x32xf32, #tpu.memory_space<vmem>>, vector<1x32xf32>
    %c0_40 = arith.constant 0 : index
    %c0_41 = arith.constant 0 : index
    %94 = vector.load %arg9[%c0_40, %c0_41] : memref<1x32xf32, #tpu.memory_space<vmem>>, vector<1x32xf32>
    %cst_42 = arith.constant dense<0.000000e+00> : vector<8xf32>
    %95 = vector.multi_reduction <add>, %92, %cst_42 [1] : vector<8x32xf32> to vector<8xf32>
    %96 = vector.shape_cast %95 : vector<8xf32> to vector<8x1xf32>
    %cst_43 = arith.constant 3.200000e+01 : f32
    %97 = vector.broadcast %cst_43 : f32 to vector<8x1xf32>
    %98 = arith.divf %96, %97 : vector<8x1xf32>
    %99 = vector.broadcast %98 : vector<8x1xf32> to vector<8x32xf32>
    %100 = arith.subf %92, %99 : vector<8x32xf32>
    %101 = arith.mulf %100, %100 : vector<8x32xf32>
    %cst_44 = arith.constant dense<0.000000e+00> : vector<8xf32>
    %102 = vector.multi_reduction <add>, %101, %cst_44 [1] : vector<8x32xf32> to vector<8xf32>
    %103 = vector.shape_cast %102 : vector<8xf32> to vector<8x1xf32>
    %cst_45 = arith.constant 3.200000e+01 : f32
    %104 = vector.broadcast %cst_45 : f32 to vector<8x1xf32>
    %105 = arith.divf %103, %104 : vector<8x1xf32>
    %cst_46 = arith.constant 9.99999974E-6 : f32
    %106 = vector.broadcast %cst_46 : f32 to vector<8x1xf32>
    %107 = arith.addf %105, %106 : vector<8x1xf32>
    %108 = math.rsqrt %107 : vector<8x1xf32>
    %109 = vector.broadcast %108 : vector<8x1xf32> to vector<8x32xf32>
    %110 = arith.mulf %100, %109 : vector<8x32xf32>
    %111 = vector.broadcast %93 : vector<1x32xf32> to vector<8x32xf32>
    %112 = arith.mulf %110, %111 : vector<8x32xf32>
    %113 = vector.broadcast %94 : vector<1x32xf32> to vector<8x32xf32>
    %114 = arith.addf %112, %113 : vector<8x32xf32>
    %115 = arith.truncf %114 : vector<8x32xf32> to vector<8x32xbf16>
    %c0_47 = arith.constant 0 : index
    %c0_48 = arith.constant 0 : index
    %116 = vector.load %arg10[%c0_47, %c0_48] : memref<32x64xbf16, #tpu.memory_space<vmem>>, vector<32x64xbf16>
    %cst_49 = arith.constant dense<0.000000e+00> : vector<8x64xf32>
    %117 = tpu.matmul %115, %116, %cst_49 {dimension_numbers = #tpu.dot_dimension_numbers<[1], [0], [0], [1], [0, 0, 1, 1], [], []>} : vector<8x32xbf16>, vector<32x64xbf16>, vector<8x64xf32> -> vector<8x64xf32>
    %c0_50 = arith.constant 0 : index
    %c0_51 = arith.constant 0 : index
    %118 = vector.load %arg11[%c0_50, %c0_51] : memref<1x64xf32, #tpu.memory_space<vmem>>, vector<1x64xf32>
    %119 = vector.broadcast %118 : vector<1x64xf32> to vector<8x64xf32>
    %120 = arith.addf %117, %119 : vector<8x64xf32>
    %cst_52 = arith.constant 5.000000e-01 : f32
    %121 = vector.broadcast %cst_52 : f32 to vector<8x64xf32>
    %122 = arith.mulf %121, %120 : vector<8x64xf32>
    %cst_53 = arith.constant 0.707106769 : f32
    %123 = vector.broadcast %cst_53 : f32 to vector<8x64xf32>
    %124 = arith.mulf %120, %123 : vector<8x64xf32>
    %cst_54 = arith.constant 0.000000e+00 : f32
    %125 = vector.broadcast %cst_54 : f32 to vector<8x64xf32>
    %126 = arith.cmpf oge, %124, %125 : vector<8x64xf32>
    %cst_55 = arith.constant 1.000000e+00 : f32
    %cst_56 = arith.constant -1.000000e+00 : f32
    %127 = vector.broadcast %cst_55 : f32 to vector<8x64xf32>
    %128 = vector.broadcast %cst_56 : f32 to vector<8x64xf32>
    %129 = arith.select %126, %127, %128 : vector<8x64xi1>, vector<8x64xf32>
    %130 = arith.mulf %124, %129 : vector<8x64xf32>
    %cst_57 = arith.constant 0.327591091 : f32
    %131 = vector.broadcast %cst_57 : f32 to vector<8x64xf32>
    %132 = arith.mulf %131, %130 : vector<8x64xf32>
    %cst_58 = arith.constant 1.000000e+00 : f32
    %133 = vector.broadcast %cst_58 : f32 to vector<8x64xf32>
    %134 = arith.addf %133, %132 : vector<8x64xf32>
    %135 = tpu.reciprocal %134 {approx = true} : vector<8x64xf32> -> vector<8x64xf32>
    %cst_59 = arith.constant 1.06140542 : f32
    %136 = vector.broadcast %cst_59 : f32 to vector<8x64xf32>
    %137 = arith.mulf %136, %135 : vector<8x64xf32>
    %cst_60 = arith.constant -1.45315206 : f32
    %138 = vector.broadcast %cst_60 : f32 to vector<8x64xf32>
    %139 = arith.addf %137, %138 : vector<8x64xf32>
    %140 = arith.mulf %139, %135 : vector<8x64xf32>
    %cst_61 = arith.constant 1.42141378 : f32
    %141 = vector.broadcast %cst_61 : f32 to vector<8x64xf32>
    %142 = arith.addf %140, %141 : vector<8x64xf32>
    %143 = arith.mulf %142, %135 : vector<8x64xf32>
    %cst_62 = arith.constant -0.284496725 : f32
    %144 = vector.broadcast %cst_62 : f32 to vector<8x64xf32>
    %145 = arith.addf %143, %144 : vector<8x64xf32>
    %146 = arith.mulf %145, %135 : vector<8x64xf32>
    %cst_63 = arith.constant 0.254829586 : f32
    %147 = vector.broadcast %cst_63 : f32 to vector<8x64xf32>
    %148 = arith.addf %146, %147 : vector<8x64xf32>
    %149 = arith.mulf %148, %135 : vector<8x64xf32>
    %cst_64 = arith.constant 0.000000e+00 : f32
    %150 = vector.broadcast %cst_64 : f32 to vector<8x64xf32>
    %151 = arith.subf %150, %130 : vector<8x64xf32>
    %152 = arith.mulf %151, %130 : vector<8x64xf32>
    %153 = math.exp %152 : vector<8x64xf32>
    %154 = arith.mulf %149, %153 : vector<8x64xf32>
    %cst_65 = arith.constant 1.000000e+00 : f32
    %155 = vector.broadcast %cst_65 : f32 to vector<8x64xf32>
    %156 = arith.subf %155, %154 : vector<8x64xf32>
    %157 = arith.mulf %129, %156 : vector<8x64xf32>
    %cst_66 = arith.constant 1.000000e+00 : f32
    %158 = vector.broadcast %cst_66 : f32 to vector<8x64xf32>
    %159 = arith.addf %158, %157 : vector<8x64xf32>
    %160 = arith.mulf %122, %159 : vector<8x64xf32>
    %161 = arith.truncf %160 : vector<8x64xf32> to vector<8x64xbf16>
    %c0_67 = arith.constant 0 : index
    %c0_68 = arith.constant 0 : index
    %162 = vector.load %arg12[%c0_67, %c0_68] : memref<64x32xbf16, #tpu.memory_space<vmem>>, vector<64x32xbf16>
    %cst_69 = arith.constant dense<0.000000e+00> : vector<8x32xf32>
    %163 = tpu.matmul %161, %162, %cst_69 {dimension_numbers = #tpu.dot_dimension_numbers<[1], [0], [0], [1], [0, 0, 1, 1], [], []>} : vector<8x64xbf16>, vector<64x32xbf16>, vector<8x32xf32> -> vector<8x32xf32>
    %c0_70 = arith.constant 0 : index
    %c0_71 = arith.constant 0 : index
    %164 = vector.load %arg13[%c0_70, %c0_71] : memref<1x32xf32, #tpu.memory_space<vmem>>, vector<1x32xf32>
    %165 = vector.broadcast %164 : vector<1x32xf32> to vector<8x32xf32>
    %166 = arith.addf %163, %165 : vector<8x32xf32>
    %167 = arith.addf %114, %166 : vector<8x32xf32>
    %c0_72 = arith.constant 0 : index
    %c0_73 = arith.constant 0 : index
    %168 = vector.load %arg14[%c0_72, %c0_73] : memref<1x32xf32, #tpu.memory_space<vmem>>, vector<1x32xf32>
    %c0_74 = arith.constant 0 : index
    %c0_75 = arith.constant 0 : index
    %169 = vector.load %arg15[%c0_74, %c0_75] : memref<1x32xf32, #tpu.memory_space<vmem>>, vector<1x32xf32>
    %cst_76 = arith.constant dense<0.000000e+00> : vector<8xf32>
    %170 = vector.multi_reduction <add>, %167, %cst_76 [1] : vector<8x32xf32> to vector<8xf32>
    %171 = vector.shape_cast %170 : vector<8xf32> to vector<8x1xf32>
    %cst_77 = arith.constant 3.200000e+01 : f32
    %172 = vector.broadcast %cst_77 : f32 to vector<8x1xf32>
    %173 = arith.divf %171, %172 : vector<8x1xf32>
    %174 = vector.broadcast %173 : vector<8x1xf32> to vector<8x32xf32>
    %175 = arith.subf %167, %174 : vector<8x32xf32>
    %176 = arith.mulf %175, %175 : vector<8x32xf32>
    %cst_78 = arith.constant dense<0.000000e+00> : vector<8xf32>
    %177 = vector.multi_reduction <add>, %176, %cst_78 [1] : vector<8x32xf32> to vector<8xf32>
    %178 = vector.shape_cast %177 : vector<8xf32> to vector<8x1xf32>
    %cst_79 = arith.constant 3.200000e+01 : f32
    %179 = vector.broadcast %cst_79 : f32 to vector<8x1xf32>
    %180 = arith.divf %178, %179 : vector<8x1xf32>
    %cst_80 = arith.constant 9.99999974E-6 : f32
    %181 = vector.broadcast %cst_80 : f32 to vector<8x1xf32>
    %182 = arith.addf %180, %181 : vector<8x1xf32>
    %183 = math.rsqrt %182 : vector<8x1xf32>
    %184 = vector.broadcast %183 : vector<8x1xf32> to vector<8x32xf32>
    %185 = arith.mulf %175, %184 : vector<8x32xf32>
    %186 = vector.broadcast %168 : vector<1x32xf32> to vector<8x32xf32>
    %187 = arith.mulf %185, %186 : vector<8x32xf32>
    %188 = vector.broadcast %169 : vector<1x32xf32> to vector<8x32xf32>
    %189 = arith.addf %187, %188 : vector<8x32xf32>
    %c0_81 = arith.constant 0 : index
    %c0_82 = arith.constant 0 : index
    %c0_83 = arith.constant 0 : index
    %190 = vector.load %arg16[%c0_81, %c0_82, %c0_83] : memref<1x8x32xf32, #tpu.memory_space<vmem>>, vector<1x8x32xf32>
    %191 = vector.shape_cast %190 : vector<1x8x32xf32> to vector<8x32xf32>
    %192 = vector.shape_cast %189 : vector<8x32xf32> to vector<1x8x32xf32>
    tpu.vector_store %arg16[%c0_81, %c0_82, %c0_83], %192 {strides = array<i32>} : memref<1x8x32xf32, #tpu.memory_space<vmem>>, vector<1x8x32xf32>,
    return
  }
  func.func @transform_0(%arg0: i32, %arg1: i32) -> (i32, i32, i32) {
    %c0_i32 = arith.constant 0 : i32
    %c0_i32_0 = arith.constant 0 : i32
    return %arg0, %arg1, %c0_i32 : i32, i32, i32
  }
  func.func @transform_1(%arg0: i32, %arg1: i32) -> (i32, i32, i32) {
    %c0_i32 = arith.constant 0 : i32
    %c0_i32_0 = arith.constant 0 : i32
    %c0_i32_1 = arith.constant 0 : i32
    return %arg0, %c0_i32, %c0_i32_0 : i32, i32, i32
  }
  func.func @transform_2(%arg0: i32, %arg1: i32) -> (i32, i32, i32) {
    %c0_i32 = arith.constant 0 : i32
    %c0_i32_0 = arith.constant 0 : i32
    %c0_i32_1 = arith.constant 0 : i32
    return %arg0, %c0_i32, %c0_i32_0 : i32, i32, i32
  }
  func.func @transform_3(%arg0: i32, %arg1: i32) -> (i32, i32, i32) {
    %c0_i32 = arith.constant 0 : i32
    %c0_i32_0 = arith.constant 0 : i32
    return %arg0, %arg1, %c0_i32 : i32, i32, i32
  }
  func.func @transform_4(%arg0: i32, %arg1: i32) -> (i32, i32) {
    %c0_i32 = arith.constant 0 : i32
    %c0_i32_0 = arith.constant 0 : i32
    %c0_i32_1 = arith.constant 0 : i32
    return %c0_i32, %c0_i32_0 : i32, i32
  }
  func.func @transform_5(%arg0: i32, %arg1: i32) -> (i32, i32) {
    %c0_i32 = arith.constant 0 : i32
    %c0_i32_0 = arith.constant 0 : i32
    %c0_i32_1 = arith.constant 0 : i32
    return %c0_i32, %c0_i32_0 : i32, i32
  }
  func.func @transform_6(%arg0: i32, %arg1: i32) -> (i32, i32) {
    %c0_i32 = arith.constant 0 : i32
    %c0_i32_0 = arith.constant 0 : i32
    %c0_i32_1 = arith.constant 0 : i32
    return %c0_i32, %c0_i32_0 : i32, i32
  }
  func.func @transform_7(%arg0: i32, %arg1: i32) -> (i32, i32) {
    %c0_i32 = arith.constant 0 : i32
    %c0_i32_0 = arith.constant 0 : i32
    %c0_i32_1 = arith.constant 0 : i32
    return %c0_i32, %c0_i32_0 : i32, i32
  }
  func.func @transform_8(%arg0: i32, %arg1: i32) -> (i32, i32) {
    %c0_i32 = arith.constant 0 : i32
    %c0_i32_0 = arith.constant 0 : i32
    %c0_i32_1 = arith.constant 0 : i32
    return %c0_i32, %c0_i32_0 : i32, i32
  }
  func.func @transform_9(%arg0: i32, %arg1: i32) -> (i32, i32) {
    %c0_i32 = arith.constant 0 : i32
    %c0_i32_0 = arith.constant 0 : i32
    %c0_i32_1 = arith.constant 0 : i32
    return %c0_i32, %c0_i32_0 : i32, i32
  }
  func.func @transform_10(%arg0: i32, %arg1: i32) -> (i32, i32) {
    %c0_i32 = arith.constant 0 : i32
    %c0_i32_0 = arith.constant 0 : i32
    %c0_i32_1 = arith.constant 0 : i32
    return %c0_i32, %c0_i32_0 : i32, i32
  }
  func.func @transform_11(%arg0: i32, %arg1: i32) -> (i32, i32) {
    %c0_i32 = arith.constant 0 : i32
    %c0_i32_0 = arith.constant 0 : i32
    %c0_i32_1 = arith.constant 0 : i32
    return %c0_i32, %c0_i32_0 : i32, i32
  }
  func.func @transform_12(%arg0: i32, %arg1: i32) -> (i32, i32) {
    %c0_i32 = arith.constant 0 : i32
    %c0_i32_0 = arith.constant 0 : i32
    %c0_i32_1 = arith.constant 0 : i32
    return %c0_i32, %c0_i32_0 : i32, i32
  }
  func.func @transform_13(%arg0: i32, %arg1: i32) -> (i32, i32) {
    %c0_i32 = arith.constant 0 : i32
    %c0_i32_0 = arith.constant 0 : i32
    %c0_i32_1 = arith.constant 0 : i32
    return %c0_i32, %c0_i32_0 : i32, i32
  }
  func.func @transform_14(%arg0: i32, %arg1: i32) -> (i32, i32, i32) {
    %c0_i32 = arith.constant 0 : i32
    %c0_i32_0 = arith.constant 0 : i32
    return %arg0, %arg1, %c0_i32 : i32, i32, i32
  }
}

</mosaic_0001>

<bundles_post_ra>
// kernel: encoder_layer_forward.2
= control target key start
LH: loop header
LB: loop body
LE: loop exit
PB: predicated region body
PF: predicated region fallthrough
CT: control target
= control target key end

     0   :  { %v153_v0 = vmov 0.0   ;;  %vm154_vm0 = vmmov 0   ;;  %vm44_vm1 = vcmask 261120   ;;  %vm97_vm2 = vcmask 257024   ;;  %s155_s28 = smov 64   ;;  %s156_s29 = smov 96   ;;  %s226_s1 = inlined_call_operand.vmem [shape: bf16[32,96], index: 1, kind: input, shape index: {}]   ;;  %s227_s0 = inlined_call_operand.vmem [shape: f32[16,32], index: 0, kind: input, shape index: {}]   ;;  %s228_s2 = inlined_call_operand.vmem [shape: f32[1,96], index: 2, kind: input, shape index: {}]   ;;  %s229_s3 = inlined_call_operand.vmem [shape: bf16[16,32], index: 3, kind: output, shape index: {0}]   ;;  %s230_s5 = inlined_call_operand.vmem [shape: bf16[16,32], index: 5, kind: output, shape index: {2}]   ;;  %s231_s4 = inlined_call_operand.vmem [shape: bf16[16,32], index: 4, kind: output, shape index: {1}]  }
   0x1   :  { %139 = vmatprep.subr.bf16.mxu0 %v153_v0  ;;  %v151_v1 = vld [vmem:[%s226_s1] sm:$0xff]   ;;  %143 = vmatprep.mubr.msk.bf16.mxu0 %vm154_vm0, %v153_v0  ;;  %v152_v2 = vld [vmem:[%s226_s1 + $0x8] sm:$0xff]  }
   0x2   :  { %140 = vmatpush3.bf16.msra.mxu0 %v151_v1  ;;  %v18_v3 = vld [vmem:[%s227_s0] sm:$0xff]  ;;  %v19_v4 = vld [vmem:[%s227_s0 + $0x8] sm:$0xff] }
   0x3   :  { %141 = vmatprep.subr.bf16.mxu0 %v153_v0  ;;  %v20_v5 = vpack.c.bf16 %v19_v4, %v18_v3  ;;  %v128_v6 = vld [vmem:[%s228_s2] ss:$0 sm:$0xff] }
   0x6   :  { %142 = vmatpush3.bf16.msra.mxu0 %v152_v2 }
   0x9   :  { %144 = vmatmul.mubr.msk.bf16.vlgmr.msra.gmra.mrb[0].mxu0 %vm44_vm1, %v20_v5 }
  0xdc   :  { %v82_v7 = vpop.f32.mrb[0].mxu0 }
  0xdd   :  { %v83_v8 = vadd.f32 %v128_v6, %v82_v7  ;;  %v145_v9 = vpop.f32.mrb[1].mxu0 }
  0xde   :  { %v85_v10 = vpop.f32.mrb[2].mxu0 }
  0xdf   :  { %v134_v11 = vpack.c.bf16 %v83_v8, %v83_v8  ;;  %v86_v12 = vadd.f32 %v128_v6, %v85_v10  ;;  %v146_v13 = vpop.f32.mrb[3].mxu0 }
  0xe1   :  { %98 = vst.msk [vmem:[%s229_s3] sm:$0xf] %vm97_vm2, %v134_v11  ;;  %v135_v14 = vpack.c.bf16 %v86_v12, %v86_v12  ;;  %108 = vrot.lane.b32.xlu1 %v134_v11, %s155_s28  ;;  %100 = vrot.lane.b32.xlu0 %v134_v11, %s156_s29 }
  0xe3   :  { %99 = vst.msk [vmem:[%s229_s3 + $0x4] sm:$0xf] %vm97_vm2, %v135_v14 }
  0xe5   :  { %110 = vrot.lane.b32.xlu1 %v135_v14, %s155_s28  ;;  %102 = vrot.lane.b32.xlu0 %v135_v14, %s156_s29 }
 0x153   :  { %v109_v15 = vpop.permute.xlu1 %108  ;;  %v101_v16 = vpop.permute.xlu0 %100 }
 0x154   :  { %114 = vst.msk [vmem:[%s230_s5] sm:$0xf] %vm97_vm2, %v109_v15  ;;  %106 = vst.msk [vmem:[%s231_s4] sm:$0xf] %vm97_vm2, %v101_v16 }
 0x157   :  { %v111_v17 = vpop.permute.xlu1 %110  ;;  %v103_v18 = vpop.permute.xlu0 %102 }
 0x158   :  { %115 = vst.msk [vmem:[%s230_s5 + $0x4] sm:$0xf] %vm97_vm2, %v111_v17  ;;  %107 = vst.msk [vmem:[%s231_s4 + $0x4] sm:$0xf] %vm97_vm2, %v103_v18 }

// kernel: encoder_layer_forward.3
= control target key start
LH: loop header
LB: loop body
LE: loop exit
PB: predicated region body
PF: predicated region fallthrough
CT: control target
= control target key end

     0   :  { %s2272_s0 = inlined_call_operand.vmem [shape: bf16[2,8,32], index: 0, kind: input, shape index: {}]   ;;  %s2273_s1 = inlined_call_operand.vmem [shape: bf16[2,8,32], index: 1, kind: input, shape index: {}]   ;;  %s2274_s2 = inlined_call_operand.vmem [shape: bf16[2,8,32], index: 2, kind: input, shape index: {}]   ;;  %s2275_s3 = inlined_call_operand.vmem [shape: f32[2,8,32], index: 3, kind: input, shape index: {}]   ;;  %s2276_s4 = inlined_call_operand.vmem [shape: bf16[32,32], index: 4, kind: input, shape index: {}]   ;;  %s2277_s5 = inlined_call_operand.vmem [shape: f32[1,32], index: 5, kind: input, shape index: {}]   ;;  %s2278_s6 = inlined_call_operand.vmem [shape: f32[1,32], index: 6, kind: input, shape index: {}]   ;;  %s2279_s7 = inlined_call_operand.vmem [shape: f32[1,32], index: 7, kind: input, shape index: {}]   ;;  %s2280_s8 = inlined_call_operand.vmem [shape: bf16[32,64], index: 8, kind: input, shape index: {}]   ;;  %s2281_s9 = inlined_call_operand.vmem [shape: f32[1,64], index: 9, kind: input, shape index: {}]   ;;  %s2282_s10 = inlined_call_operand.vmem [shape: bf16[64,32], index: 10, kind: input, shape index: {}]   ;;  %s2283_s11 = inlined_call_operand.vmem [shape: f32[1,32], index: 11, kind: input, shape index: {}]   ;;  %s2284_s12 = inlined_call_operand.vmem [shape: f32[1,32], index: 12, kind: input, shape index: {}]   ;;  %s2285_s13 = inlined_call_operand.vmem [shape: f32[1,32], index: 13, kind: input, shape index: {}]   ;;  %s2286_s14 = inlined_call_operand.hbm [shape: f32[2,8,32], index: 14, kind: output, shape index: {}]  }
   0x1   :  { %2289 = sst [smem:[#allocation7_spill]] %s2272_s0 }
   0x2   :  { %2290 = sst [smem:[#allocation8_spill]] %s2273_s1 }
   0x3   :  { %2291 = sst [smem:[#allocation9_spill]] %s2274_s2 }
   0x4   :  { %2292 = sst [smem:[#allocation10_spill]] %s2275_s3 }
   0x5   :  { %19 = vsyncpa [#allocation3], 0 }
   0x6   :  { %21 = vsyncpa [#allocation3 + $0x1], 0  ;;  %s1991_s29 = smov 0   ;;  %s1993_s30 = smov 0  }
   0x7   :  { %s1995_s15 = smov 0   ;;  %s1997_s16 = smov 0  }
   0x8   :  { %s1999_s17 = smov 0   ;;  %s2001_s18 = smov 0  }
   0x9 LB: > { %2293 = sst [smem:[#allocation5_spill]] %s1903_s17  ;;  %s1567_s19 = sadd.s32 4294967295, %s1907_s18   ;;  %s1907_s18 = sphi %s2001_s18, %s27_s18   ;;  %s1903_s17 = sphi %s1999_s17, %s2302_s17   ;;  %s1899_s16 = sphi %s1997_s16, %s2301_s16   ;;  %s1895_s15 = sphi %s1995_s15, %s2305_s15   ;;  %s1891_s30 = sphi %s1993_s30, %s2304_s30   ;;  %s1887_s29 = sphi %s1991_s29, %s2303_s29  }
   0xa   : > { %s1568_s20 = sadd.s32 4294967294, %s1907_s18   ;;  %s39_s21 = sadd.s32 1, %s1903_s17 }
   0xb   : > { %s366_s22 = sadd.s32 1, %s1895_s15  ;;  %p41_p0 = scmp.ge.s32.totalorder %s39_s21, 2 }
   0xc   : > { %p376_p1 = scmp.ne.s32.totalorder %s1895_s15, %s1891_s30  ;;  %p377_p2 = scmp.eq.s32.totalorder %s1567_s19, 1 }
   0xd   : > { %p382_p3 = scmp.ne.s32.totalorder %s1891_s30, %s1887_s29  ;;  %s2307_s21 = smov (%p41_p0, %s39_s21), 0 }
   0xe   : > { %2294 = sst [smem:[#allocation6_spill]] %s2307_s21  ;;  %p2031_p4 = por %p377_p2, %p376_p1 }
   0xf   : > { %p383_p5 = scmp.eq.s32.totalorder %s1568_s20, 1  ;;  %s361_s24 = ssub.s32 %s1903_s17, %s2307_s21 }
  0x10   : > { %p1571_p6 = scmp.ge.s32.totalorder %s1907_s18, 1  ;;  %p364_p7 = scmp.eq.s32.totalorder %s361_s24, 0 }
  0x11   : > { %p2038_p8 = por %p383_p5, %p382_p3  ;;  %p465_p9 = scmp.lt.s32.totalorder %s1907_s18, 3 }
  0x12   : > { %s2044_s26 = scalar_select %p364_p7, %s1895_s15, %s366_s22  }
  0x13   : > { %p466_p10 = pnand %p1571_p6, %p465_p9 }
  0x14   : > { %p528_p11 = scmp.lt.s32.totalorder (!%p466_p10), %s1899_s16, 1  ;;  %v1909_v0 = vmov (!%p466_p10), 0.0   ;;  %vm1910_vm0 = vmmov (!%p466_p10), 0   ;;  %vm554_vm1 = vcmask (!%p466_p10), 64512   ;;  %s2297_s1 = sld [smem:[#allocation8_spill]] (!%p466_p10)  ;;  %vm614_vm2 = vcmask (!%p466_p10), 1043456  }
  0x15   : > { %469 = sbr.rel (%p466_p10) target bundleno = 3326 (0xcfe), region = 76  ;;  %1643 = vmatprep.subr.bf16.mxu0 (!%p466_p10), %v1909_v0  ;;  %1645 = vmatprep.mubr.msk.bf16.mxu0 (!%p466_p10), %vm1910_vm0, %v1909_v0  ;;  %s2298_s0 = sld [smem:[#allocation7_spill]] (!%p466_p10)  ;;  %v661_v40 = vld [vmem:[%s2276_s4] sm:$0xf] (!%p466_p10)  ;;  %v782_v42 = vld [vmem:[%s2276_s4 + $0x4] sm:$0xf] (!%p466_p10) }
  0x16   : > { %1649 = vmatprep.subr.bf16.mxu1 (!%p466_p10), %v1909_v0  ;;  %1651 = vmatprep.mubr.msk.bf16.mxu1 (!%p466_p10), %vm1910_vm0, %v1909_v0  ;;  %s1911_s19 = smov (!%p466_p10), 120   ;;  %s2299_s2 = sld [smem:[#allocation9_spill]] (!%p466_p10)  ;;  %v833_v41 = vsel (!%p466_p10), %vm614_vm2, %v661_v40, 0  ;;  %v787_v43 = vsel (!%p466_p10), %vm614_vm2, %v782_v42, 0  ;;  %vm1205_vm3 = vcmask (!%p466_p10), 261120   ;;  %vm1367_vm5 = vcmask (!%p466_p10), 523264  }
  0x17   : > { %s1913_s21 = smov (!%p466_p10), 104   ;;  %s2300_s3 = sld [smem:[#allocation10_spill]] (!%p466_p10) }
  0x1c   : > { %s2051_s27 = scalar_select %p528_p11, %s1899_s16, 1 }
  0x1e   : > { %s1573_s28 = sshll.u32 %s2051_s27, 2 }
  0x1f   : > { %s538_s22 = scalar_lea.vmem %s2297_s1, %s1573_s28  ;;  %s534_s17 = scalar_lea.vmem %s2298_s0, %s1573_s28 }
  0x20   : > { %v552_v1 = vld [vmem:[%s538_s22] sm:$0xf]  ;;  %s542_s20 = scalar_lea.vmem %s2299_s2, %s1573_s28  ;;  %s1912_s28 = smov 112  }
  0x21   : > { %v559_v2 = vsel %vm554_vm1, %v552_v1, 0  ;;  %v551_v3 = vld [vmem:[%s534_s17] sm:$0xf]  ;;  %v2072_v10 = vcombine.low %v552_v1, %v552_v1 }
  0x22   : > { %1644 = vmatpush3.bf16.xpose.msra.mxu0 %v559_v2  ;;  %v2068_v4 = vcombine.low %v551_v3, %v551_v3  ;;  %v553_v11 = vld [vmem:[%s542_s20] sm:$0xf] }
  0x23   : > { %1673 = vmatprep.subr.bf16.mxu0 %v1909_v0  ;;  %v616_v12 = vsel %vm614_vm2, %v553_v11, 0  ;;  %v2079_v13 = vcombine.low %v553_v11, %v553_v11 }
  0x24   : > { %665 = vrot.lane.b32.xlu1 %v2068_v4, %s1911_s19  ;;  %1650 = vmatpush3.bf16.msra.mxu1 %v616_v12 }
  0x25   : > { %1655 = vmatprep.subr.bf16.mxu1 %v1909_v0 }
  0x29   : > { %1646 = vmatmul.mubr.msk.bf16.vlgmr.msra.gmra.mrb[0].mxu0 %vm554_vm1, %v551_v3 }
  0x2a   : > { %1675 = vmatprep.mubr.msk.bf16.mxu0 %vm1910_vm0, %v1909_v0  ;;  %1674 = vmatpush3.bf16.msra.mxu0 %v833_v41 }
  0x2b   : > { %1685 = vmatprep.subr.bf16.mxu0 %v1909_v0 }
  0x96   : > { %v666_v21 = vpop.permute.xlu1 %665 }
  0xfc   : > { %v595_v5 = vpop.f32.mrb[0].mxu0 }
  0xfd   : > { %v1647_v6 = vpop.f32.mrb[1].mxu0  ;;  %v601_v7 = vsel %vm554_vm1, %v595_v5, -inf }
  0xfe   : > { %602 = vmax.xlane.f32.xlu0 %v601_v7  ;;  %v598_v8 = vpop.f32.mrb[2].mxu0 }
  0xff   : > { %v1648_v9 = vpop.f32.mrb[3].mxu0 }
 0x114   : > { %670 = vrot.lane.b32.xlu0 %v2072_v10, %s1911_s19 }
 0x118   : > { %731 = vrot.lane.b32.xlu0 %v2079_v13, %s1911_s19  ;;  %s1576_s19 = sshll.u32 %s2051_s27, 3 }
 0x119   : > { %s549_s20 = scalar_lea.vmem %s2300_s3, %s1576_s19  ;;  %s1608_s19 = sshll.u32 %s1899_s16, 7 }
 0x11a   : > { %s2224_s3 = scalar_lea.hbm %s2286_s14, %s1608_s19  ;;  %s1915_s16 = smov [#allocation2]  }
 0x18b   : > { %v603_v14 = vpop.xlane.xlu0 %602 }
 0x18c   : > { %v604_v15 = vsub.f32 %v595_v5, %v603_v14 }
 0x18e   : > { %v605_v16 = vmul.f32 1.442695, %v604_v15 }
 0x18f   : > { %v671_v17 = vpop.permute.xlu0 %670 }
 0x190   : > { %1805 = vpow2.f32 %v605_v16  ;;  %v676_v19 = vsel %vm554_vm1, %v671_v17, 0 }
 0x193   : > { %v732_v31 = vpop.permute.xlu0 %731 }
 0x194   : > { %v737_v32 = vsel %vm614_vm2, %v732_v31, 0 }
 0x19a   : > { %v1806_v18 = vpop.eup %1805 }
 0x19b   : > { %v610_v20 = vpack.c.bf16 %v1806_v18, %v1806_v18  ;;  %v607_v39 = vsel %vm554_vm1, %v1806_v18, 0.0 }
 0x19d   : > { %1652 = vmatmul.mubr.msk.bf16.vlgmr.msra.gmra.mrb[0].mxu1 %vm554_vm1, %v610_v20 }
 0x19e   : > { %1656 = vmatpush3.bf16.xpose.msra.mxu1 %v676_v19  ;;  %1657 = vmatprep.mubr.msk.bf16.mxu1 %vm1910_vm0, %v1909_v0 }
 0x19f   : > { %1661 = vmatprep.subr.bf16.mxu1 %v1909_v0 }
 0x1a5   : > { %1658 = vmatmul.mubr.msk.bf16.vlgmr.msra.gmra.mrb[4].mxu1 %vm554_vm1, %v666_v21 }
 0x1a6   : > { %1663 = vmatprep.mubr.msk.bf16.mxu1 %vm1910_vm0, %v1909_v0  ;;  %1662 = vmatpush3.bf16.msra.mxu1 %v737_v32 }
 0x1a7   : > { %1667 = vmatprep.subr.bf16.mxu1 %v1909_v0 }
 0x270   : > { %v652_v22 = vpop.f32.mrb[0].mxu1 }
 0x271   : > { %v1653_v23 = vpop.f32.mrb[1].mxu1 }
 0x272   : > { %v655_v24 = vpop.f32.mrb[2].mxu1 }
 0x273   : > { %v1654_v25 = vpop.f32.mrb[3].mxu1 }
 0x278   : > { %v712_v26 = vpop.f32.mrb[4].mxu1 }
 0x279   : > { %v1659_v27 = vpop.f32.mrb[5].mxu1  ;;  %v718_v28 = vsel %vm554_vm1, %v712_v26, -inf }
 0x27a   : > { %719 = vmax.xlane.f32.xlu1 %v718_v28  ;;  %v715_v29 = vpop.f32.mrb[6].mxu1 }
 0x27b   : > { %v1660_v30 = vpop.f32.mrb[7].mxu1 }
 0x28b   : > { %877 = vrot.lane.b32.xlu1 %v2072_v10, %s1912_s28 }
 0x28f   : > { %875 = vrot.lane.b32.xlu1 %v2068_v4, %s1912_s28 }
 0x307   : > { %v720_v33 = vpop.xlane.xlu1 %719 }
 0x308   : > { %v721_v34 = vsub.f32 %v712_v26, %v720_v33 }
 0x30a   : > { %v722_v35 = vmul.f32 1.442695, %v721_v34 }
 0x30b   : > { %v878_v51 = vpop.permute.xlu1 %877 }
 0x30c   : > { %1807 = vpow2.f32 %v722_v35  ;;  %v883_v56 = vsel %vm554_vm1, %v878_v51, 0 }
 0x30f   : > { %v876_v58 = vpop.permute.xlu1 %875 }
 0x316   : > { %v1808_v36 = vpop.eup %1807 }
 0x317   : > { %v724_v37 = vsel %vm554_vm1, %v1808_v36, 0.0  ;;  %v727_v38 = vpack.c.bf16 %v1808_v36, %v1808_v36 }
 0x318   : > { %725 = vadd.xlane.f32.xlu0 %v724_v37 }
 0x319   : > { %1664 = vmatmul.mubr.msk.bf16.vlgmr.msra.gmra.mrb[8].mxu1 %vm554_vm1, %v727_v38 }
 0x31a   : > { %1669 = vmatprep.mubr.msk.bf16.mxu1 %vm1910_vm0, %v1909_v0  ;;  %1668 = vmatpush3.bf16.msra.mxu1 %v787_v43 }
 0x31b   : > { %1679 = vmatprep.subr.bf16.mxu1 %v1909_v0 }
 0x31c   : > { %608 = vadd.xlane.f32.xlu0 %v607_v39 }
 0x332   : > { %935 = vrot.lane.b32.xlu0 %v2079_v13, %s1912_s28 }
 0x336   : > { %1036 = vrot.lane.b32.xlu0 %v2072_v10, %s1913_s21 }
 0x33a   : > { %1034 = vrot.lane.b32.xlu0 %v2068_v4, %s1913_s21 }
 0x3a5   : > { %v726_v44 = vpop.xlane.xlu0 %725 }
 0x3a9   : > { %v609_v45 = vpop.xlane.xlu0 %608 }
 0x3aa   : > { %1809 = vrcp.f32 %v609_v45 }
 0x3ab   : > { %1811 = vrcp.f32 %v726_v44 }
 0x3ad   : > { %v936_v11 = vpop.permute.xlu0 %935 }
 0x3ae   : > { %v941_v4 = vsel %vm614_vm2, %v936_v11, 0 }
 0x3b1   : > { %v1037_v16 = vpop.permute.xlu0 %1036 }
 0x3b2   : > { %v1042_v18 = vsel %vm554_vm1, %v1037_v16, 0 }
 0x3b4   : > { %v1810_v46 = vpop.eup %1809 }
 0x3b5   : > { %v659_v47 = vmul.f32 %v1810_v46, %v652_v22  ;;  %v1812_v49 = vpop.eup %1811  ;;  %v1035_v21 = vpop.permute.xlu0 %1034  ;;  %v986_v22 = vld [vmem:[%s2276_s4 + $0x8] sm:$0xf] }
 0x3b6   : > { %v991_v23 = vsel %vm614_vm2, %v986_v22, 0 }
 0x3b7   : > { %v660_v48 = vpack.c.bf16 %v659_v47, %v659_v47 }
 0x3b9   : > { %1676 = vmatmul.mubr.msk.bf16.vlgmr.msra.gmra.mrb[4].mxu0 %vm554_vm1, %v660_v48 }
 0x3ba   : > { %1687 = vmatprep.mubr.msk.bf16.mxu0 %vm1910_vm0, %v1909_v0  ;;  %1686 = vmatpush3.bf16.msra.mxu0 %v941_v4  ;;  %v1799_v4 = vld [vmem:[%s2280_s8] sm:$0xff]  }
 0x3bb   : > { %1697 = vmatprep.subr.bf16.mxu0 %v1909_v0 }
 0x3ec   : > { %v773_v50 = vpop.f32.mrb[8].mxu1 }
 0x3ed   : > { %v780_v52 = vmul.f32 %v1812_v49, %v773_v50  ;;  %v1665_v53 = vpop.f32.mrb[9].mxu1 }
 0x3ee   : > { %v776_v54 = vpop.f32.mrb[10].mxu1 }
 0x3ef   : > { %v781_v55 = vpack.c.bf16 %v780_v52, %v780_v52  ;;  %v1666_v57 = vpop.f32.mrb[11].mxu1 }
 0x3f1   : > { %1670 = vmatmul.mubr.msk.bf16.vlgmr.msra.gmra.mrb[12].mxu1 %vm554_vm1, %v781_v55 }
 0x3f2   : > { %1680 = vmatpush3.bf16.xpose.msra.mxu1 %v883_v56  ;;  %1681 = vmatprep.mubr.msk.bf16.mxu1 %vm1910_vm0, %v1909_v0 }
 0x3f3   : > { %1691 = vmatprep.subr.bf16.mxu1 %v1909_v0 }
 0x3f9   : > { %1682 = vmatmul.mubr.msk.bf16.vlgmr.msra.gmra.mrb[16].mxu1 %vm554_vm1, %v876_v58 }
 0x3fa   : > { %1693 = vmatprep.mubr.msk.bf16.mxu1 %vm1910_vm0, %v1909_v0  ;;  %1692 = vmatpush3.bf16.msra.mxu1 %v991_v23 }
 0x3fb   : > { %1703 = vmatprep.subr.bf16.mxu1 %v1909_v0 }
 0x48c   : > { %v869_v59 = vpop.f32.mrb[4].mxu0 }
 0x48d   : > { %v1677_v60 = vpop.f32.mrb[5].mxu0 }
 0x48e   : > { %v872_v61 = vpop.f32.mrb[6].mxu0  ;;  %v1592_v60 = vld [vmem:[%s2277_s5] ss:$0 sm:$0xff] }
 0x48f   : > { %v1678_v62 = vpop.f32.mrb[7].mxu0 }
 0x4c4   : > { %v823_v63 = vpop.f32.mrb[12].mxu1 }
 0x4c5   : > { %v2127_v1 = vadd.f32 %v869_v59, %v823_v63  ;;  %v1671_v2 = vpop.f32.mrb[13].mxu1 }
 0x4c6   : > { %v826_v3 = vpop.f32.mrb[14].mxu1 }
 0x4c7   : > { %v1672_v5 = vpop.f32.mrb[15].mxu1 }
 0x4cc   : > { %v919_v6 = vpop.f32.mrb[16].mxu1 }
 0x4cd   : > { %v1683_v7 = vpop.f32.mrb[17].mxu1  ;;  %v925_v8 = vsel %vm554_vm1, %v919_v6, -inf }
 0x4ce   : > { %926 = vmax.xlane.f32.xlu1 %v925_v8  ;;  %v922_v9 = vpop.f32.mrb[18].mxu1 }
 0x4cf   : > { %v1684_v10 = vpop.f32.mrb[19].mxu1 }
 0x55b   : > { %v927_v12 = vpop.xlane.xlu1 %926 }
 0x55c   : > { %v928_v14 = vsub.f32 %v919_v6, %v927_v12  ;;  %v1800_v12 = vld [vmem:[%s2280_s8 + $0x8] sm:$0xff]  }
 0x55e   : > { %v929_v15 = vmul.f32 1.442695, %v928_v14 }
 0x560   : > { %1813 = vpow2.f32 %v929_v15 }
 0x56a   : > { %v1814_v17 = vpop.eup %1813 }
 0x56b   : > { %v931_v19 = vsel %vm554_vm1, %v1814_v17, 0.0  ;;  %v934_v20 = vpack.c.bf16 %v1814_v17, %v1814_v17 }
 0x56c   : > { %932 = vadd.xlane.f32.xlu0 %v931_v19 }
 0x56d   : > { %1688 = vmatmul.mubr.msk.bf16.vlgmr.msra.gmra.mrb[8].mxu0 %vm554_vm1, %v934_v20  ;;  %v1594_v20 = vld [vmem:[%s2279_s7] ss:$0 sm:$0xff] }
 0x56e   : > { %1698 = vmatpush3.bf16.xpose.msra.mxu0 %v1042_v18  ;;  %1699 = vmatprep.mubr.msk.bf16.mxu0 %vm1910_vm0, %v1909_v0  ;;  %v1593_v18 = vld [vmem:[%s2278_s6] ss:$0 sm:$0xff] }
 0x56f   : > { %1709 = vmatprep.subr.bf16.mxu0 %v1909_v0 }
 0x575   : > { %1700 = vmatmul.mubr.msk.bf16.vlgmr.msra.gmra.mrb[12].mxu0 %vm554_vm1, %v1035_v21 }
 0x576   : > { %1711 = vmatprep.mubr.msk.bf16.mxu0 %vm1910_vm0, %v1909_v0 }
 0x5f9   : > { %v933_v24 = vpop.xlane.xlu0 %932 }
 0x5fa   : > { %1815 = vrcp.f32 %v933_v24  ;;  %v1801_v24 = vld [vmem:[%s2282_s10] sm:$0xff]  }
 0x604   : > { %v1816_v25 = vpop.eup %1815 }
 0x640   : > { %v977_v26 = vpop.f32.mrb[8].mxu0 }
 0x641   : > { %v984_v27 = vmul.f32 %v1816_v25, %v977_v26  ;;  %v1689_v28 = vpop.f32.mrb[9].mxu0  ;;  %v1802_v25 = vld [vmem:[%s2282_s10 + $0x8] sm:$0xff]   ;;  %v1803_v26 = vld [vmem:[%s2282_s10 + $0x10] sm:$0xff]  }
 0x642   : > { %v980_v29 = vpop.f32.mrb[10].mxu0  ;;  %v1595_v28 = vld [vmem:[%s2281_s9] ss:$0 sm:$0xff] }
 0x643   : > { %v985_v30 = vpack.c.bf16 %v984_v27, %v984_v27  ;;  %v1690_v31 = vpop.f32.mrb[11].mxu0  ;;  %v1804_v27 = vld [vmem:[%s2282_s10 + $0x18] sm:$0xff]  }
 0x645   : > { %1694 = vmatmul.mubr.msk.bf16.vlgmr.msra.gmra.mrb[20].mxu1 %vm554_vm1, %v985_v30 }
 0x646   : > { %1705 = vmatprep.mubr.msk.bf16.mxu1 %vm1910_vm0, %v1909_v0 }
 0x648   : > { %v1078_v32 = vpop.f32.mrb[12].mxu0 }
 0x649   : > { %v1701_v33 = vpop.f32.mrb[13].mxu0  ;;  %v1084_v34 = vsel %vm554_vm1, %v1078_v32, -inf }
 0x64a   : > { %1085 = vmax.xlane.f32.xlu1 %v1084_v34  ;;  %v1081_v35 = vpop.f32.mrb[14].mxu0 }
 0x64b   : > { %v1702_v36 = vpop.f32.mrb[15].mxu0  ;;  %v1914_v35 = vmov -1.0  }
 0x65b   : > { %1094 = vrot.lane.b32.xlu1 %v2079_v13, %s1913_s21  ;;  %v1145_v13 = vld [vmem:[%s2276_s4 + $0xc] sm:$0xf]  ;;  %s525_s21 = sand.u32 1, %s1891_s30  }
 0x65c   : > { %v1150_v45 = vsel %vm614_vm2, %v1145_v13, 0  ;;  %s1443_s28 = scalar_lea.sflag [#allocation3], %s525_s21 }
 0x65d   : > { %1710 = vmatpush3.bf16.msra.mxu0 %v1150_v45 }
 0x65e   : > { %1723 = vmatprep.subr.bf16.mxu0 %v1909_v0 }
 0x6d7   : > { %v1086_v37 = vpop.xlane.xlu1 %1085 }
 0x6d8   : > { %v1087_v38 = vsub.f32 %v1078_v32, %v1086_v37 }
 0x6da   : > { %v1088_v39 = vmul.f32 1.442695, %v1087_v38 }
 0x6db   : > { %v1095_v40 = vpop.permute.xlu1 %1094 }
 0x6dc   : > { %1817 = vpow2.f32 %v1088_v39  ;;  %v1100_v41 = vsel %vm614_vm2, %v1095_v40, 0 }
 0x6dd   : > { %1704 = vmatpush3.bf16.msra.mxu1 %v1100_v41 }
 0x6de   : > { %1715 = vmatprep.subr.bf16.mxu1 %v1909_v0 }
 0x6e6   : > { %v1818_v42 = vpop.eup %1817 }
 0x6e7   : > { %v1090_v43 = vsel %vm554_vm1, %v1818_v42, 0.0  ;;  %v1093_v44 = vpack.c.bf16 %v1818_v42, %v1818_v42 }
 0x6e8   : > { %1091 = vadd.xlane.f32.xlu1 %v1090_v43 }
 0x6e9   : > { %1706 = vmatmul.mubr.msk.bf16.vlgmr.msra.gmra.mrb[24].mxu1 %vm554_vm1, %v1093_v44 }
 0x6ea   : > { %1719 = vmatprep.mubr.msk.bf16.mxu1 %vm1910_vm0, %v1909_v0  ;;  %1716 = vmatpush3.bf16.msra.mxu1 %v1799_v4 }
 0x6eb   : > { %1717 = vmatprep.subr.bf16.mxu1 %v1909_v0 }
 0x6ee   : > { %1718 = vmatpush3.bf16.msra.mxu1 %v1800_v12 }
 0x718   : > { %v1027_v46 = vpop.f32.mrb[20].mxu1 }
 0x719   : > { %v1033_v47 = vadd.f32 %v1027_v46, %v2127_v1  ;;  %v1695_v48 = vpop.f32.mrb[21].mxu1  ;;  %v1201_v1 = vld [vmem:[%s549_s20] sm:$0xff]  ;;  %s1572_s20 = sshll.u32 %s525_s21, 3 }
 0x71a   : > { %v1030_v49 = vpop.f32.mrb[22].mxu1  ;;  %s527_s17 = scalar_lea.vmem [#allocation2], %s1572_s20  ;;  %s1833_s20 = sshll.u32 %s1915_s16, 4  ;;  %s1834_s20 = int_to_ptr.vmem [resolvable:$false] %s1833_s20 }
 0x71b   : > { %v1696_v50 = vpop.f32.mrb[23].mxu1  ;;  %s1457_s0 = sshll.u32 %s527_s17, 4  ;;  %s1835_s27 = scalar_lea.vmem %s1834_s20, 256  ;;  %s2226_s0 = int_to_ptr.vmem [resolvable:$true] %s1457_s0 }
 0x71c   : > { %s1829_s22 = scalar_lea.vmem %s2226_s0, 128  ;;  %p1836_p1 = scmp.lt.s32.totalorder %s2226_s0, %s1834_s20 }
 0x71d   : > { %p1830_p12 = scmp.ne.s32.totalorder %s2226_s0, %s1829_s22  ;;  %p1837_p2 = scmp.lt.s32.totalorder %s1835_s27, %s1829_s22 }
 0x71f   : > { %p1831_p13 = pnand %p1830_p12, %p2031_p4  ;;  %p1838_p3 = por %p1837_p2, %p1836_p1 }
 0x721   : > { %p1832_p0 = pneg %p1831_p13 }
 0x723   : > { %p1839_p5 = pnand %p1838_p3, %p1832_p0 }
 0x775   : > { %v1092_v51 = vpop.xlane.xlu1 %1091 }
 0x776   : > { %1819 = vrcp.f32 %v1092_v51 }
 0x780   : > { %v1820_v52 = vpop.eup %1819 }
 0x7bc   : > { %v1136_v53 = vpop.f32.mrb[24].mxu1 }
 0x7bd   : > { %v1143_v54 = vmul.f32 %v1820_v52, %v1136_v53  ;;  %v1707_v55 = vpop.f32.mrb[25].mxu1 }
 0x7be   : > { %v1139_v56 = vpop.f32.mrb[26].mxu1 }
 0x7bf   : > { %v1144_v57 = vpack.c.bf16 %v1143_v54, %v1143_v54  ;;  %v1708_v58 = vpop.f32.mrb[27].mxu1 }
 0x7c1   : > { %1712 = vmatmul.mubr.msk.bf16.vlgmr.msra.gmra.mrb[16].mxu0 %vm554_vm1, %v1144_v57 }
 0x7c2   : > { %1731 = vmatprep.mubr.msk.bf16.mxu0 %vm1910_vm0, %v1909_v0  ;;  %1724 = vmatpush3.bf16.msra.mxu0 %v1801_v24 }
 0x7c3   : > { %1725 = vmatprep.subr.bf16.mxu0 %v1909_v0 }
 0x7c6   : > { %1726 = vmatpush3.bf16.msra.mxu0 %v1802_v25 }
 0x7c7   : > { %1727 = vmatprep.subr.bf16.mxu0 %v1909_v0 }
 0x7ca   : > { %1728 = vmatpush3.bf16.msra.mxu0 %v1803_v26 }
 0x7cb   : > { %1729 = vmatprep.subr.bf16.mxu0 %v1909_v0 }
 0x7ce   : > { %1730 = vmatpush3.bf16.msra.mxu0 %v1804_v27 }
 0x894   : > { %v1186_v59 = vpop.f32.mrb[16].mxu0 }
 0x895   : > { %v1192_v61 = vadd.f32 %v1186_v59, %v1033_v47  ;;  %v1713_v62 = vpop.f32.mrb[17].mxu0  ;;  %v1599_v59 = vld [vmem:[%s2283_s11] ss:$0 sm:$0xff] }
 0x896   : > { %v1189_v63 = vpop.f32.mrb[18].mxu0 }
 0x897   : > { %v1200_v2 = vadd.f32 %v1592_v60, %v1192_v61  ;;  %v1714_v3 = vpop.f32.mrb[19].mxu0 }
 0x899   : > { %v1202_v5 = vadd.f32 %v1201_v1, %v1200_v2 }
 0x89b   : > { %v1206_v6 = vsel %vm1205_vm3, %v1202_v5, 0.0 }
 0x89c   : > { %1207 = vadd.xlane.f32.xlu0 %v1206_v6 }
 0x929   : > { %v1208_v7 = vpop.xlane.xlu0 %1207 }
 0x92a   : > { %v1210_v8 = vmul.f32 0.03125, %v1208_v7 }
 0x92c   : > { %v1211_v9 = vsub.f32 %v1202_v5, %v1210_v8 }
 0x92e   : > { %v1212_v10 = vmul.f32 %v1211_v9, %v1211_v9 }
 0x930   : > { %v1213_v11 = vsel %vm1205_vm3, %v1212_v10, 0.0 }
 0x931   : > { %1214 = vadd.xlane.f32.xlu0 %v1213_v11 }
 0x9be   : > { %v1215_v14 = vpop.xlane.xlu0 %1214 }
 0x9bf   : > { %v1216_v15 = vmul.f32 0.03125, %v1215_v14  ;;  %v1605_v14 = vld [vmem:[%s2284_s12] ss:$0 sm:$0xff] }
 0x9c1   : > { %v1217_v16 = vadd.f32 1e-05, %v1216_v15 }
 0x9c3   : > { %1821 = vrsqrt.f32 %v1217_v16  ;;  %v1606_v16 = vld [vmem:[%s2285_s13] ss:$0 sm:$0xff] }
 0x9cd   : > { %v1822_v17 = vpop.eup %1821 }
 0x9ce   : > { %v1219_v19 = vmul.f32 %v1822_v17, %v1211_v9 }
 0x9d0   : > { %v1226_v21 = vmul.f32 %v1593_v18, %v1219_v19 }
 0x9d2   : > { %v1233_v22 = vadd.f32 %v1594_v20, %v1226_v21 }
 0x9d4   : > { %v1234_v23 = vpack.c.bf16 %v1233_v22, %v1233_v22 }
 0x9d6   : > { %1720 = vmatmul.mubr.msk.bf16.vlgmr.msra.gmra.mrb[28].mxu1 %vm1205_vm3, %v1234_v23 }
 0xaa9   : > { %v1295_v29 = vpop.f32.mrb[28].mxu1 }
 0xaaa   : > { %v1296_v30 = vadd.f32 %v1595_v28, %v1295_v29  ;;  %v1721_v31 = vpop.f32.mrb[29].mxu1 }
 0xaab   : > { %v1298_v32 = vpop.f32.mrb[30].mxu1 }
 0xaac   : > { %v1302_v33 = vmul.f32 0.70710677, %v1296_v30  ;;  %v1722_v34 = vpop.f32.mrb[31].mxu1  ;;  %v1301_v55 = vmul.f32 0.5, %v1296_v30 }
 0xaae   : > { %vm1303_vm4 = vcmp.ge.f32.partialorder %v1302_v33, 0.0 }
 0xaaf   : > { %v1304_v36 = vsel %vm1303_vm4, 1.0, %v1914_v35 }
 0xab0   : > { %v1305_v37 = vmul.f32 %v1304_v36, %v1302_v33 }
 0xab2   : > { %v1306_v0 = vmul.f32 0.3275911, %v1305_v37  ;;  %v1318_v39 = vsub.f32 0.0, %v1305_v37 }
 0xab4   : > { %v1307_v38 = vadd.f32 1.0, %v1306_v0  ;;  %v1319_v41 = vmul.f32 %v1318_v39, %v1305_v37 }
 0xab6   : > { %1823 = vrcp.f32 %v1307_v38  ;;  %v1320_v44 = vmul.f32 1.442695, %v1319_v41 }
 0xab8   : > { %1825 = vpow2.f32 %v1320_v44 }
 0xac0   : > { %v1824_v40 = vpop.eup %1823 }
 0xac1   : > { %v1309_v42 = vmul.f32 1.0614054, %v1824_v40 }
 0xac2   : > { %v1826_v51 = vpop.eup %1825 }
 0xac3   : > { %v1310_v43 = vadd.f32 -1.4531521, %v1309_v42 }
 0xac5   : > { %v1311_v13 = vmul.f32 %v1824_v40, %v1310_v43 }
 0xac7   : > { %v1312_v45 = vadd.f32 1.4214138, %v1311_v13 }
 0xac9   : > { %v1313_v46 = vmul.f32 %v1824_v40, %v1312_v45 }
 0xacb   : > { %v1314_v47 = vadd.f32 -0.28449672, %v1313_v46 }
 0xacd   : > { %v1315_v48 = vmul.f32 %v1824_v40, %v1314_v47 }
 0xacf   : > { %v1316_v49 = vadd.f32 0.2548296, %v1315_v48 }
 0xad1   : > { %v1317_v50 = vmul.f32 %v1824_v40, %v1316_v49 }
 0xad3   : > { %v1322_v52 = vmul.f32 %v1826_v51, %v1317_v50 }
 0xad5   : > { %v1323_v53 = vsub.f32 1.0, %v1322_v52 }
 0xad7   : > { %v1324_v54 = vmul.f32 %v1323_v53, %v1304_v36 }
 0xad9   : > { %v1325_v56 = vadd.f32 1.0, %v1324_v54 }
 0xadb   : > { %v1326_v57 = vmul.f32 %v1325_v56, %v1301_v55 }
 0xadd   : > { %v1327_v58 = vpack.c.bf16 %v1326_v57, %v1326_v57 }
 0xadf   : > { %1732 = vmatmul.mubr.msk.bf16.vlgmr.msra.gmra.mrb[20].mxu0 %vm1367_vm5, %v1327_v58 }
 0xbb2   : > { %v1405_v60 = vpop.f32.mrb[20].mxu0 }
 0xbb3   : > { %v1406_v61 = vadd.f32 %v1599_v59, %v1405_v60  ;;  %v1733_v62 = vpop.f32.mrb[21].mxu0 }
 0xbb4   : > { %v1408_v63 = vpop.f32.mrb[22].mxu0 }
 0xbb5   : > { %v1734_v1 = vpop.f32.mrb[23].mxu0  ;;  %v1411_v2 = vadd.f32 %v1406_v61, %v1233_v22 }
 0xbb7   : > { %v1414_v3 = vsel %vm1205_vm3, %v1411_v2, 0.0 }
 0xbb8   : > { %1415 = vadd.xlane.f32.xlu0 %v1414_v3 }
 0xc45   : > { %v1416_v5 = vpop.xlane.xlu0 %1415 }
 0xc46   : > { %v1417_v6 = vmul.f32 0.03125, %v1416_v5 }
 0xc48   : > { %v1418_v7 = vsub.f32 %v1411_v2, %v1417_v6 }
 0xc4a   : > { %v1419_v8 = vmul.f32 %v1418_v7, %v1418_v7 }
 0xc4c   : > { %v1420_v9 = vsel %vm1205_vm3, %v1419_v8, 0.0 }
 0xc4d   : > { %1421 = vadd.xlane.f32.xlu0 %v1420_v9 }
 0xcda   : > { %v1422_v10 = vpop.xlane.xlu0 %1421 }
 0xcdb   : > { %v1423_v11 = vmul.f32 0.03125, %v1422_v10 }
 0xcdd   : > { %v1424_v4 = vadd.f32 1e-05, %v1423_v11 }
 0xcdf   : > { %1827 = vrsqrt.f32 %v1424_v4 }
 0xce9   : > { %v1828_v12 = vpop.eup %1827 }
 0xcea   : > { %v1426_v15 = vmul.f32 %v1828_v12, %v1418_v7 }
 0xcec   : > { %v1433_v17 = vmul.f32 %v1605_v14, %v1426_v15 }
 0xcee   : > { %v1440_v18 = vadd.f32 %v1606_v16, %v1433_v17 }
 0xcf0   : > { %1441 = vst.msk [vmem:[%s527_s17] sm:$0xff] %vm1205_vm3, %v1440_v18 }
 0xcf1   : > { %1842 = shalt.err (!%p1839_p5)
}
 0xcf2   : > { %s1843_s1 = scalar_lea.hbm %s2224_s3, 128  ;;  %s1847_s24 = scalar_lea.hbm %s2286_s14, 256 }
 0xcf3   : > { %p1844_p6 = scmp.ne.s32.totalorder %s2224_s3, %s1843_s1  ;;  %p1848_p10 = scmp.lt.u32.totalorder %s2224_s3, %s2286_s14 }
 0xcf4   : > { %p1849_p11 = scmp.lt.u32.totalorder %s1847_s24, %s1843_s1  ;;  %p1851_p13 = scmp.lt.u32.totalorder %s1843_s1, %s2224_s3 }
 0xcf5   : > { %p1845_p7 = pnand %p1844_p6, %p2031_p4 }
 0xcf6   : > { %p1850_p12 = por %p1849_p11, %p1848_p10 }
 0xcf7   : > { %p1846_p9 = pneg %p1845_p7 }
 0xcf8   : > { %p1852_p0 = por %p1851_p13, %p1850_p12 }
 0xcfa   : > { %p1853_p1 = pnand %p1852_p0, %p1846_p9 }
 0xcfc   : > { %1856 = shalt.err (!%p1853_p1)
}
 0xcfd   : > { %1735 = dma.vmem_to_hbm [thread:$0]  (%p2031_p4), %s2226_s0, 128, %s2224_s3, %s1443_s28  }
 0xcfe PF: > { %p1741_p2 = scmp.ge.s32.totalorder %s1907_s18, 2  ;;  %s1469_s22 = sand.u32 1, %s1887_s29  }
 0xcff   : > { %s1470_s16 = scalar_lea.sflag [#allocation3], %s1469_s22 }
 0xd00   : > { %p1738_p3 = pnand %p1741_p2, %p2038_p8 }
 0xd02   : > { %1882 = dma.done.wait (!%p1738_p3), %s1470_s16, 128  }
 0xd03   : > { %1884 = vsyncadd (!%p1738_p3), %s1470_s16, 4294967168  ;;  %s27_s18 = sadd.s32 1, %s1907_s18   ;;  %s2301_s16 = sld [smem:[#allocation5_spill]] }
 0xd04   : > { %p24_p5 = scmp.ge.s32.totalorder %s27_s18, 4   ;;  %s2302_s17 = sld [smem:[#allocation6_spill]] }
 0xd05   : > { %s2303_s29 = smov %s1891_s30  ;;  %s2304_s30 = smov %s1895_s15 }
 0xd06   : > { %s2305_s15 = smov %s2044_s26  ;;  %26 = sbr.rel (!%p24_p5) target bundleno = 9 (0x9), region = 120 }
 0xd0d   :  { %1475 = vsyncpa [#allocation3], 1 }
 0xd0e   :  { %1477 = vsyncpa [#allocation3 + $0x1], 1 }

</bundles_post_ra>
